<compile_context>
chip_gen: v5e
topology: v5e:2x2
jax: 0.10.0
libtpu: 0.0.40
codegen_flags: <defaults>
</compile_context>

<pallas_src>
import functools

import jax
import jax.numpy as jnp
from jax.experimental import pallas as pl
from jax.experimental.pallas import tpu as pltpu


def _mlp_kernel(x_ref,
                w1_ref, t1_ref,
                w2_ref, t2_ref,
                w3_ref, t3_ref,
                w4_ref, b4_ref,
                o_ref):
    # x tile arrives as raw f32 (tm, len_f); cast to bf16 in-kernel.
    # Weights are bf16 with the BN scale pre-folded into their columns;
    # shifts/bias stay f32 for the VPU epilogues. All matmuls accumulate
    # in f32 on the MXU.
    x = x_ref[...].astype(jnp.bfloat16)

    # fc1 (+ folded BN1) -> relu        (dropout = identity in eval mode)
    h = jnp.dot(x, w1_ref[...], preferred_element_type=jnp.float32)
    h = jnp.maximum(h + t1_ref[...], 0.0)

    # fc2 (+ folded BN2) -> relu
    h = jnp.dot(h.astype(jnp.bfloat16), w2_ref[...],
                preferred_element_type=jnp.float32)
    h = jnp.maximum(h + t2_ref[...], 0.0)

    # fc3 (+ folded BN3) -> relu
    h = jnp.dot(h.astype(jnp.bfloat16), w3_ref[...],
                preferred_element_type=jnp.float32)
    h = jnp.maximum(h + t3_ref[...], 0.0)

    # fc4 -> relu, computed as W4 @ h^T so the per-tile result is a
    # lane-dense (*, tm) row block instead of a (tm, 128) zero-padded slab.
    # The transpose rides the XLU; writeback shrinks ~128x. W4 is an
    # (8, 128) slab whose rows 1..7 are zero; only row 0 is stored.
    ht = h.T.astype(jnp.bfloat16)                                 # (128, tm)
    out8 = jnp.dot(w4_ref[...], ht, preferred_element_type=jnp.float32)  # (8, tm)
    out8 = jnp.maximum(out8 + b4_ref[...], 0.0)

    o_ref[...] = out8[0:1, :].astype(o_ref.dtype)                 # (1, tm)


@functools.partial(jax.jit, static_argnames=("tm",))
def nn_forward(x, params, tm=512):
    """Fused MLP forward. x: (N, len_f) f32. Returns (N, 1) f32."""
    (w1, t1, w2, t2, w3, t3, w4, b4) = params
    n, f = x.shape
    assert tm % 128 == 0 and tm >= 128
    assert w1.shape[0] == f

    # Batch tile: big tiles amortize the per-grid-step overhead, but keep at
    # least two grid steps when the batch allows it so both v7x TensorCores
    # get work (single-TC v5e/v6e are unaffected).
    n_pad128 = pl.cdiv(n, 128) * 128
    if n_pad128 <= tm:
        tm_eff = pl.cdiv(n_pad128 // 2, 128) * 128 if n_pad128 >= 256 else n_pad128
    else:
        tm_eff = tm
    n_pad = pl.cdiv(n, tm_eff) * tm_eff

    # Row-only pad (no feature padding, no dtype cast), and only when needed.
    xp = x if n_pad == n else jnp.pad(x, ((0, n_pad - n), (0, 0)))

    full = lambda i: (0, 0)   # weights/shifts: same block every step (resident)
    grid = (n_pad // tm_eff,)

    out = pl.pallas_call(
        _mlp_kernel,
        out_shape=jax.ShapeDtypeStruct((1, n_pad), jnp.float32),
        grid_spec=pltpu.PrefetchScalarGridSpec(
            num_scalar_prefetch=0,
            grid=grid,
            in_specs=[
                pl.BlockSpec((tm_eff, f), lambda i: (i, 0)),   # x tile, raw f32
                pl.BlockSpec(w1.shape, full),                  # W1' (f, 512)   bf16
                pl.BlockSpec(t1.shape, full),                  # shift1 (1, 512) f32
                pl.BlockSpec(w2.shape, full),                  # W2' (512, 256) bf16
                pl.BlockSpec(t2.shape, full),                  # shift2 (1, 256) f32
                pl.BlockSpec(w3.shape, full),                  # W3' (256, 128) bf16
                pl.BlockSpec(t3.shape, full),                  # shift3 (1, 128) f32
                pl.BlockSpec(w4.shape, full),                  # W4 slab (8, 128) bf16
                pl.BlockSpec(b4.shape, full),                  # b4 (1, 1) f32
            ],
            out_specs=pl.BlockSpec((1, tm_eff), lambda i: (0, i)),
        ),
        compiler_params=pltpu.CompilerParams(
            dimension_semantics=("parallel",)),
    )(xp, w1, t1, w2, t2, w3, t3, w4, b4)

    # Kernel output is a lane-dense (1, n_pad) row; real result = first n cols.
    return out[0, :n].reshape(n, 1)


def _fold_bn_into_weight(w, b, gamma, beta, mean, var, eps=1e-5):
    """y = BN(x @ W + b) = x @ (W * scale) + shift   (inference mode)."""
    scale = gamma / jnp.sqrt(var + eps)
    shift = (b - mean) * scale + beta
    return w * scale[None, :], shift[None, :]


def init_params(key, len_f):
    """Build torch-equivalent params, fold BN, and cast/layout for the kernel."""
    dims = [(len_f, 512), (512, 256), (256, 128), (128, 1)]
    keys = jax.random.split(key, 20)           # 4 linears * 2 + 3 BNs * 4 = 20
    ki = iter(range(20))

    def linear(shape):
        fan_in = shape[0]
        bound = 1.0 / jnp.sqrt(jnp.float32(fan_in))
        w = jax.random.uniform(keys[next(ki)], shape, jnp.float32, -bound, bound)
        b = jax.random.uniform(keys[next(ki)], (shape[1],), jnp.float32, -bound, bound)
        return w, b

    w1, b1 = linear(dims[0])
    w2, b2 = linear(dims[1])
    w3, b3 = linear(dims[2])
    w4, b4 = linear(dims[3])

    def bn(h):
        gamma = 1.0 + 0.1 * jax.random.normal(keys[next(ki)], (h,), jnp.float32)
        beta = 0.1 * jax.random.normal(keys[next(ki)], (h,), jnp.float32)
        mean = 0.05 * jax.random.normal(keys[next(ki)], (h,), jnp.float32)
        var = 1.0 + 0.1 * jax.random.uniform(keys[next(ki)], (h,), jnp.float32)
        return gamma, beta, mean, var

    g1, be1, m1, v1 = bn(512)
    g2, be2, m2, v2 = bn(256)
    g3, be3, m3, v3 = bn(128)

    # Fold BN scale into the weight columns; only a shift remains per layer.
    w1f, t1 = _fold_bn_into_weight(w1, b1, g1, be1, m1, v1)
    w2f, t2 = _fold_bn_into_weight(w2, b2, g2, be2, m2, v2)
    w3f, t3 = _fold_bn_into_weight(w3, b3, g3, be3, m3, v3)

    # fc4 stored as an (8, 128) row-slab (rows 1..7 zero) so the kernel can
    # compute W4 @ h^T with MXU M >= 8 and emit a lane-dense output row.
    w4_slab = jnp.zeros((8, 128), jnp.float32).at[0, :].set(w4[:, 0])
    b4_arr = b4.reshape(1, 1)

    # Weights feed the MXU in bf16; shifts/bias stay f32 for the VPU epilogues.
    return (w1f.astype(jnp.bfloat16), t1,
            w2f.astype(jnp.bfloat16), t2,
            w3f.astype(jnp.bfloat16), t3,
            w4_slab.astype(jnp.bfloat16), b4_arr)


def reference_forward(x, params):
    """Plain-JAX reference mirroring the kernel's bf16-matmul / f32-epilogue math."""
    (w1, t1, w2, t2, w3, t3, w4, b4) = params
    h = jnp.maximum(jnp.dot(x.astype(jnp.bfloat16), w1,
                            preferred_element_type=jnp.float32) + t1, 0.0)
    h = jnp.maximum(jnp.dot(h.astype(jnp.bfloat16), w2,
                            preferred_element_type=jnp.float32) + t2, 0.0)
    h = jnp.maximum(jnp.dot(h.astype(jnp.bfloat16), w3,
                            preferred_element_type=jnp.float32) + t3, 0.0)
    out = jnp.maximum(jnp.dot(h.astype(jnp.bfloat16), w4.T,
                              preferred_element_type=jnp.float32) + b4, 0.0)
    return out[:, 0:1]


if __name__ == "__main__":
    key = jax.random.PRNGKey(0)
    len_f = 32       # tabular features after dropping ['num_sold','row_id','date']
    batch = 16

    kx, kp = jax.random.split(key)
    x = jax.random.normal(kx, (batch, len_f), jnp.float32)
    params = init_params(kp, len_f)

    out = nn_forward(x, params)
    jax.block_until_ready(out)

    ref = reference_forward(x, params)
    assert out.shape == (batch, 1)
    assert jnp.allclose(out, ref, atol=2e-3, rtol=2e-3), "mismatch vs reference"

    print("KERNEL_OK")
</pallas_src>

<mosaic_0001>
module attributes {stable_mosaic.version = 11 : i64} {
  func.func @_mlp_kernel(%arg0: i32, %arg1: memref<128x32xf32, #tpu.memory_space<vmem>>, %arg2: memref<32x512xbf16, #tpu.memory_space<vmem>>, %arg3: memref<1x512xf32, #tpu.memory_space<vmem>>, %arg4: memref<512x256xbf16, #tpu.memory_space<vmem>>, %arg5: memref<1x256xf32, #tpu.memory_space<vmem>>, %arg6: memref<256x128xbf16, #tpu.memory_space<vmem>>, %arg7: memref<1x128xf32, #tpu.memory_space<vmem>>, %arg8: memref<8x128xbf16, #tpu.memory_space<vmem>>, %arg9: memref<1x1xf32, #tpu.memory_space<vmem>>, %arg10: memref<1x128xf32, #tpu.memory_space<vmem>>) attributes {dimension_semantics = [#tpu.dimension_semantics<parallel>], iteration_bounds = array<i64: 1>, scalar_prefetch = 0 : i64, scratch_operands = 0 : i64, tpu.core_type = #tpu.core_type<tc>, window_params = [{transform_indices = @transform_0, window_bounds = array<i64: 128, 32>}, {pipeline_mode = #tpu.pipeline_mode<synchronous>, transform_indices = @transform_1, window_bounds = array<i64: 32, 512>}, {pipeline_mode = #tpu.pipeline_mode<synchronous>, transform_indices = @transform_2, window_bounds = array<i64: 1, 512>}, {pipeline_mode = #tpu.pipeline_mode<synchronous>, transform_indices = @transform_3, window_bounds = array<i64: 512, 256>}, {pipeline_mode = #tpu.pipeline_mode<synchronous>, transform_indices = @transform_4, window_bounds = array<i64: 1, 256>}, {pipeline_mode = #tpu.pipeline_mode<synchronous>, transform_indices = @transform_5, window_bounds = array<i64: 256, 128>}, {pipeline_mode = #tpu.pipeline_mode<synchronous>, transform_indices = @transform_6, window_bounds = array<i64: 1, 128>}, {pipeline_mode = #tpu.pipeline_mode<synchronous>, transform_indices = @transform_7, window_bounds = array<i64: 8, 128>}, {pipeline_mode = #tpu.pipeline_mode<synchronous>, transform_indices = @transform_8, window_bounds = array<i64: 1, 1>}, {transform_indices = @transform_9, window_bounds = array<i64: 1, 128>}]} {
    %c0 = arith.constant 0 : index
    %c0_0 = arith.constant 0 : index
    %0 = vector.load %arg1[%c0, %c0_0] : memref<128x32xf32, #tpu.memory_space<vmem>>, vector<128x32xf32>
    %1 = arith.truncf %0 : vector<128x32xf32> to vector<128x32xbf16>
    %c0_1 = arith.constant 0 : index
    %c0_2 = arith.constant 0 : index
    %2 = vector.load %arg2[%c0_1, %c0_2] : memref<32x512xbf16, #tpu.memory_space<vmem>>, vector<32x512xbf16>
    %cst = arith.constant dense<0.000000e+00> : vector<128x512xf32>
    %3 = tpu.matmul %1, %2, %cst {dimension_numbers = #tpu.dot_dimension_numbers<[1], [0], [0], [1], [0, 0, 1, 1], [], []>} : vector<128x32xbf16>, vector<32x512xbf16>, vector<128x512xf32> -> vector<128x512xf32>
    %c0_3 = arith.constant 0 : index
    %c0_4 = arith.constant 0 : index
    %4 = vector.load %arg3[%c0_3, %c0_4] : memref<1x512xf32, #tpu.memory_space<vmem>>, vector<1x512xf32>
    %5 = vector.broadcast %4 : vector<1x512xf32> to vector<128x512xf32>
    %6 = arith.addf %3, %5 : vector<128x512xf32>
    %cst_5 = arith.constant 0.000000e+00 : f32
    %7 = vector.broadcast %cst_5 : f32 to vector<128x512xf32>
    %8 = arith.maximumf %6, %7 : vector<128x512xf32>
    %9 = arith.truncf %8 : vector<128x512xf32> to vector<128x512xbf16>
    %c0_6 = arith.constant 0 : index
    %c0_7 = arith.constant 0 : index
    %10 = vector.load %arg4[%c0_6, %c0_7] : memref<512x256xbf16, #tpu.memory_space<vmem>>, vector<512x256xbf16>
    %cst_8 = arith.constant dense<0.000000e+00> : vector<128x256xf32>
    %11 = tpu.matmul %9, %10, %cst_8 {dimension_numbers = #tpu.dot_dimension_numbers<[1], [0], [0], [1], [0, 0, 1, 1], [], []>} : vector<128x512xbf16>, vector<512x256xbf16>, vector<128x256xf32> -> vector<128x256xf32>
    %c0_9 = arith.constant 0 : index
    %c0_10 = arith.constant 0 : index
    %12 = vector.load %arg5[%c0_9, %c0_10] : memref<1x256xf32, #tpu.memory_space<vmem>>, vector<1x256xf32>
    %13 = vector.broadcast %12 : vector<1x256xf32> to vector<128x256xf32>
    %14 = arith.addf %11, %13 : vector<128x256xf32>
    %cst_11 = arith.constant 0.000000e+00 : f32
    %15 = vector.broadcast %cst_11 : f32 to vector<128x256xf32>
    %16 = arith.maximumf %14, %15 : vector<128x256xf32>
    %17 = arith.truncf %16 : vector<128x256xf32> to vector<128x256xbf16>
    %c0_12 = arith.constant 0 : index
    %c0_13 = arith.constant 0 : index
    %18 = vector.load %arg6[%c0_12, %c0_13] : memref<256x128xbf16, #tpu.memory_space<vmem>>, vector<256x128xbf16>
    %cst_14 = arith.constant dense<0.000000e+00> : vector<128x128xf32>
    %19 = tpu.matmul %17, %18, %cst_14 {dimension_numbers = #tpu.dot_dimension_numbers<[1], [0], [0], [1], [0, 0, 1, 1], [], []>} : vector<128x256xbf16>, vector<256x128xbf16>, vector<128x128xf32> -> vector<128x128xf32>
    %c0_15 = arith.constant 0 : index
    %c0_16 = arith.constant 0 : index
    %20 = vector.load %arg7[%c0_15, %c0_16] : memref<1x128xf32, #tpu.memory_space<vmem>>, vector<1x128xf32>
    %21 = vector.broadcast %20 : vector<1x128xf32> to vector<128x128xf32>
    %22 = arith.addf %19, %21 : vector<128x128xf32>
    %cst_17 = arith.constant 0.000000e+00 : f32
    %23 = vector.broadcast %cst_17 : f32 to vector<128x128xf32>
    %24 = arith.maximumf %22, %23 : vector<128x128xf32>
    %25 = tpu.transpose %24, [1, 0] : vector<128x128xf32> -> vector<128x128xf32>
    %26 = arith.truncf %25 : vector<128x128xf32> to vector<128x128xbf16>
    %c0_18 = arith.constant 0 : index
    %c0_19 = arith.constant 0 : index
    %27 = vector.load %arg8[%c0_18, %c0_19] : memref<8x128xbf16, #tpu.memory_space<vmem>>, vector<8x128xbf16>
    %cst_20 = arith.constant dense<0.000000e+00> : vector<8x128xf32>
    %28 = tpu.matmul %27, %26, %cst_20 {dimension_numbers = #tpu.dot_dimension_numbers<[1], [0], [0], [1], [0, 0, 1, 1], [], []>} : vector<8x128xbf16>, vector<128x128xbf16>, vector<8x128xf32> -> vector<8x128xf32>
    %c0_21 = arith.constant 0 : index
    %c0_22 = arith.constant 0 : index
    %29 = vector.load %arg9[%c0_21, %c0_22] : memref<1x1xf32, #tpu.memory_space<vmem>>, vector<1x1xf32>
    %30 = vector.broadcast %29 : vector<1x1xf32> to vector<8x128xf32>
    %31 = arith.addf %28, %30 : vector<8x128xf32>
    %cst_23 = arith.constant 0.000000e+00 : f32
    %32 = vector.broadcast %cst_23 : f32 to vector<8x128xf32>
    %33 = arith.maximumf %31, %32 : vector<8x128xf32>
    %34 = vector.extract_strided_slice %33 {offsets = [0, 0], sizes = [1, 128], strides = [1, 1]} : vector<8x128xf32> to vector<1x128xf32>
    %c0_24 = arith.constant 0 : index
    %c0_25 = arith.constant 0 : index
    %35 = vector.load %arg10[%c0_24, %c0_25] : memref<1x128xf32, #tpu.memory_space<vmem>>, vector<1x128xf32>
    tpu.vector_store %arg10[%c0_24, %c0_25], %34 {strides = array<i32>} : memref<1x128xf32, #tpu.memory_space<vmem>>, vector<1x128xf32>,
    return
  }
  func.func @transform_0(%arg0: i32) -> (i32, i32) {
    %c0_i32 = arith.constant 0 : i32
    %c0_i32_0 = arith.constant 0 : i32
    return %arg0, %c0_i32 : i32, i32
  }
  func.func @transform_1(%arg0: i32) -> (i32, i32) {
    %c0_i32 = arith.constant 0 : i32
    %c0_i32_0 = arith.constant 0 : i32
    %c0_i32_1 = arith.constant 0 : i32
    return %c0_i32, %c0_i32_0 : i32, i32
  }
  func.func @transform_2(%arg0: i32) -> (i32, i32) {
    %c0_i32 = arith.constant 0 : i32
    %c0_i32_0 = arith.constant 0 : i32
    %c0_i32_1 = arith.constant 0 : i32
    return %c0_i32, %c0_i32_0 : i32, i32
  }
  func.func @transform_3(%arg0: i32) -> (i32, i32) {
    %c0_i32 = arith.constant 0 : i32
    %c0_i32_0 = arith.constant 0 : i32
    %c0_i32_1 = arith.constant 0 : i32
    return %c0_i32, %c0_i32_0 : i32, i32
  }
  func.func @transform_4(%arg0: i32) -> (i32, i32) {
    %c0_i32 = arith.constant 0 : i32
    %c0_i32_0 = arith.constant 0 : i32
    %c0_i32_1 = arith.constant 0 : i32
    return %c0_i32, %c0_i32_0 : i32, i32
  }
  func.func @transform_5(%arg0: i32) -> (i32, i32) {
    %c0_i32 = arith.constant 0 : i32
    %c0_i32_0 = arith.constant 0 : i32
    %c0_i32_1 = arith.constant 0 : i32
    return %c0_i32, %c0_i32_0 : i32, i32
  }
  func.func @transform_6(%arg0: i32) -> (i32, i32) {
    %c0_i32 = arith.constant 0 : i32
    %c0_i32_0 = arith.constant 0 : i32
    %c0_i32_1 = arith.constant 0 : i32
    return %c0_i32, %c0_i32_0 : i32, i32
  }
  func.func @transform_7(%arg0: i32) -> (i32, i32) {
    %c0_i32 = arith.constant 0 : i32
    %c0_i32_0 = arith.constant 0 : i32
    %c0_i32_1 = arith.constant 0 : i32
    return %c0_i32, %c0_i32_0 : i32, i32
  }
  func.func @transform_8(%arg0: i32) -> (i32, i32) {
    %c0_i32 = arith.constant 0 : i32
    %c0_i32_0 = arith.constant 0 : i32
    %c0_i32_1 = arith.constant 0 : i32
    return %c0_i32, %c0_i32_0 : i32, i32
  }
  func.func @transform_9(%arg0: i32) -> (i32, i32) {
    %c0_i32 = arith.constant 0 : i32
    %c0_i32_0 = arith.constant 0 : i32
    return %c0_i32, %arg0 : i32, i32
  }
}

</mosaic_0001>

<bundles_post_ra>
// kernel: nn_forward.1
= control target key start
LH: loop header
LB: loop body
LE: loop exit
PB: predicated region body
PF: predicated region fallthrough
CT: control target
= control target key end

     0   :  { %s2887_s0 = inlined_call_operand.vmem [shape: f32[128,32], index: 0, kind: input, shape index: {}]   ;;  %s2888_s1 = inlined_call_operand.hbm [shape: bf16[32,512], index: 1, kind: input, shape index: {}]   ;;  %s2889_s2 = inlined_call_operand.vmem [shape: f32[1,512], index: 2, kind: input, shape index: {}]   ;;  %s2890_s3 = inlined_call_operand.hbm [shape: bf16[512,256], index: 3, kind: input, shape index: {}]   ;;  %s2891_s4 = inlined_call_operand.vmem [shape: f32[1,256], index: 4, kind: input, shape index: {}]   ;;  %s2892_s5 = inlined_call_operand.vmem [shape: bf16[256,128], index: 5, kind: input, shape index: {}]   ;;  %s2893_s6 = inlined_call_operand.vmem [shape: f32[1,128], index: 6, kind: input, shape index: {}]   ;;  %s2894_s7 = inlined_call_operand.vmem [shape: bf16[8,128], index: 7, kind: input, shape index: {}]   ;;  %s2895_s8 = inlined_call_operand.<no memory space> [shape: f32[1,1], index: 8, kind: input, shape index: {}]   ;;  %s2896_s9 = inlined_call_operand.vmem [shape: f32[1,128], index: 9, kind: output, shape index: {}]  }
   0x1   :  { %v14_v0 = vstv %s2895_s8 }
   0x2   :  { %15 = vst [vmem:[#allocation2] sm:$0x1] %v14_v0 }
   0x3   :  { %16 = vsyncpa [#allocation4], 0  ;;  %s24_s13 = sshll.u32 %s2888_s1, 4  ;;  %s25_s13 = int_to_ptr.hbm [resolvable:$true] %s24_s13 }
   0x4   :  { %17 = vsyncpa [#allocation6], 0  ;;  %s2150_s14 = smov [#allocation3]   ;;  %s39_s18 = sshll.u32 %s2890_s3, 4  ;;  %s40_s18 = int_to_ptr.hbm [resolvable:$true] %s39_s18 }
   0x5   :  { %s26_s15 = sshll.u32 %s2150_s14, 4  ;;  %s2151_s19 = smov 256   ;;  %s27_s15 = int_to_ptr.vmem [resolvable:$true] %s26_s15 }
   0x6   :  { %s2152_s20 = smov 16   ;;  %s2153_s8 = smov [#allocation5]  }
   0x7   :  { %32 = dma.hbm_to_vmem [thread:$0]  %s25_s13, 1024, %s27_s15, [#allocation4], %s2151_s19, %s2151_s19, %s2152_s20  }
   0x8   :  { %s41_s21 = sshll.u32 %s2153_s8, 4  ;;  %s2154_s22 = smov 128   ;;  %s42_s21 = int_to_ptr.vmem [resolvable:$true] %s41_s21 }
   0x9   :  { %s2155_s23 = smov 8  }
   0xa   :  { %47 = dma.hbm_to_vmem [thread:$0]  %s40_s18, 8192, %s42_s21, [#allocation6], %s2154_s22, %s2154_s22, %s2155_s23  }
   0xb   :  { %2146 = dma.done.wait [#allocation4], 1024  }
   0xc   :  { %2147 = vsyncadd [#allocation4], 4294966272 }
   0xd   :  { %2148 = dma.done.wait [#allocation6], 8192  }
   0xe   :  { %2149 = vsyncadd [#allocation6], 4294959104  ;;  %v1629_v1 = vld [vmem:[#allocation3 + $0x20] sm:$0xf]  ;;  %v2001_v2 = vld [vmem:[#allocation3 + $0x2c] sm:$0xf0] }
   0xf   :  { %v1999_v3 = vld [vmem:[#allocation3 + $0x24] sm:$0xf]  ;;  %v1630_v4 = vor.u32 %v2001_v2, %v1629_v1  ;;  %v1631_v5 = vld [vmem:[#allocation3 + $0x30] sm:$0xf0]  ;;  %v1613_v6 = vld [vmem:[#allocation3] sm:$0xf] }
  0x10   :  { %v1997_v7 = vld [vmem:[#allocation3 + $0xc] sm:$0xf0]  ;;  %v1634_v8 = vor.u32 %v1999_v3, %v1631_v5  ;;  %v1995_v9 = vld [vmem:[#allocation3 + $0x4] sm:$0xf]  ;;  %v1615_v10 = vld [vmem:[#allocation3 + $0x10] sm:$0xf0] }
  0x11   :  { %v67_v11 = vld [vmem:[%s2887_s0] sm:$0xff]  ;;  %180 = vmatpush.bf16.msra.mxu0 %v1630_v4  ;;  %2083 = vmatpush.bf16.msra.mxu3 %v1630_v4  ;;  %v1614_v12 = vor.u32 %v1997_v7, %v1613_v6  ;;  %v68_v13 = vld [vmem:[%s2887_s0 + $0x8] sm:$0xff]  ;;  %v77_v14 = vld [vmem:[%s2887_s0 + $0x50] sm:$0xff]  ;;  %v1618_v16 = vor.u32 %v1995_v9, %v1615_v10  ;;  %vm149_vm0 = vcmask 261120  }
  0x12   :  { %v78_v15 = vld [vmem:[%s2887_s0 + $0x58] sm:$0xff]  ;;  %229 = vmatpush.bf16.msra.mxu1 %v1634_v8  ;;  %2085 = vmatpush.bf16.msra.mxu2 %v1634_v8  ;;  %v83_v17 = vpack.c.bf16 %v68_v13, %v67_v11  ;;  %v1637_v19 = vld [vmem:[#allocation3 + $0x28] sm:$0xf]  ;;  %v2000_v21 = vld [vmem:[#allocation3 + $0x2c] sm:$0xf] }
  0x13   :  { %v2228_v18 = vpack.c.bf16 %v78_v15, %v77_v14  ;;  %v2002_v20 = vld [vmem:[#allocation3 + $0x34] sm:$0xf0]  ;;  %v1639_v23 = vld [vmem:[#allocation3 + $0x38] sm:$0xf0]  ;;  %v1621_v24 = vld [vmem:[#allocation3 + $0x8] sm:$0xf] }
  0x14   :  { %v1638_v22 = vor.u32 %v2002_v20, %v1637_v19  ;;  %v1998_v25 = vld [vmem:[#allocation3 + $0x14] sm:$0xf0]  ;;  %v1642_v26 = vor.u32 %v2000_v21, %v1639_v23  ;;  %v1996_v27 = vld [vmem:[#allocation3 + $0xc] sm:$0xf]  ;;  %v1623_v28 = vld [vmem:[#allocation3 + $0x18] sm:$0xf0] }
  0x15   :  { %181 = vmatpush.bf16.msra.mxu0 %v1614_v12  ;;  %2084 = vmatpush.bf16.msra.mxu3 %v1614_v12  ;;  %v1622_v29 = vor.u32 %v1998_v25, %v1621_v24  ;;  %v1626_v30 = vor.u32 %v1996_v27, %v1623_v28  ;;  %v69_v31 = vld [vmem:[%s2887_s0 + $0x10] sm:$0xff]  ;;  %v70_v32 = vld [vmem:[%s2887_s0 + $0x18] sm:$0xff]  ;;  %v79_v33 = vld [vmem:[%s2887_s0 + $0x60] sm:$0xff] }
  0x16   :  { %230 = vmatpush.bf16.msra.mxu1 %v1618_v16  ;;  %2086 = vmatpush.bf16.msra.mxu2 %v1618_v16  ;;  %v80_v34 = vld [vmem:[%s2887_s0 + $0x68] sm:$0xff]  ;;  %v84_v35 = vpack.c.bf16 %v70_v32, %v69_v31  ;;  %v71_v37 = vld [vmem:[%s2887_s0 + $0x20] sm:$0xff]  ;;  %v81_v39 = vld [vmem:[%s2887_s0 + $0x70] sm:$0xff] }
  0x17   :  { %v2248_v36 = vpack.c.bf16 %v80_v34, %v79_v33  ;;  %v72_v38 = vld [vmem:[%s2887_s0 + $0x28] sm:$0xff]  ;;  %v82_v40 = vld [vmem:[%s2887_s0 + $0x78] sm:$0xff]  ;;  %v73_v43 = vld [vmem:[%s2887_s0 + $0x30] sm:$0xff] }
  0x18   :  { %1643 = vmatmul.msk.bf16.vlgmr.msra.gmra.mxu0 %vm149_vm0, %v83_v17  ;;  %1648 = vmatmul.msk.bf16.vlgmr.msra.gmra.mxu3 %vm149_vm0, %v2228_v18  ;;  %v85_v41 = vpack.c.bf16 %v72_v38, %v71_v37  ;;  %v2268_v42 = vpack.c.bf16 %v82_v40, %v81_v39  ;;  %v74_v44 = vld [vmem:[%s2887_s0 + $0x38] sm:$0xff]  ;;  %v75_v46 = vld [vmem:[%s2887_s0 + $0x40] sm:$0xff]  ;;  %v76_v47 = vld [vmem:[%s2887_s0 + $0x48] sm:$0xff] }
  0x19   :  { %1651 = vmatmul.msk.bf16.vlgmr.msra.gmra.mxu1 %vm149_vm0, %v83_v17  ;;  %1656 = vmatmul.msk.bf16.vlgmr.msra.gmra.mxu2 %vm149_vm0, %v2228_v18  ;;  %v86_v45 = vpack.c.bf16 %v74_v44, %v73_v43  ;;  %v2292_v48 = vpack.c.bf16 %v76_v47, %v75_v46  ;;  %v1733_v49 = vld [vmem:[#allocation5 + $0x70] sm:$0xf]  ;;  %v2018_v50 = vld [vmem:[#allocation5 + $0x74] sm:$0xf0]  ;;  %v1725_v55 = vld [vmem:[#allocation5 + $0x60] sm:$0xf] }
  0x1a   :  { %278 = vmatpush.bf16.msrb.mxu2 %v1638_v22  ;;  %327 = vmatpush.bf16.msrb.mxu3 %v1642_v26  ;;  %v1797_v51 = vld [vmem:[#allocation5 + $0xf0] sm:$0xf]  ;;  %v1734_v52 = vor.u32 %v2018_v50, %v1733_v49  ;;  %v2034_v53 = vld [vmem:[#allocation5 + $0xf4] sm:$0xf0]  ;;  %v2016_v56 = vld [vmem:[#allocation5 + $0x64] sm:$0xf0] }
  0x1b   :  { %v1798_v54 = vor.u32 %v2034_v53, %v1797_v51  ;;  %v1789_v57 = vld [vmem:[#allocation5 + $0xe0] sm:$0xf]  ;;  %v1726_v58 = vor.u32 %v2016_v56, %v1725_v55  ;;  %v2032_v59 = vld [vmem:[#allocation5 + $0xe4] sm:$0xf0]  ;;  %v1717_v61 = vld [vmem:[#allocation5 + $0x50] sm:$0xf] }
  0x1c   :  { %856 = vmatpush.bf16.msrb.mxu0 %v1734_v52  ;;  %v1790_v60 = vor.u32 %v2032_v59, %v1789_v57  ;;  %v2014_v62 = vld [vmem:[#allocation5 + $0x54] sm:$0xf0]  ;;  %v1781_v63 = vld [vmem:[#allocation5 + $0xd0] sm:$0xf]  ;;  %v1709_v3 = vld [vmem:[#allocation5 + $0x40] sm:$0xf] }
  0x1d   :  { %905 = vmatpush.bf16.msrb.mxu1 %v1798_v54  ;;  %v1718_v0 = vor.u32 %v2014_v62, %v1717_v61  ;;  %v2030_v1 = vld [vmem:[#allocation5 + $0xd4] sm:$0xf0]  ;;  %v2012_v4 = vld [vmem:[#allocation5 + $0x44] sm:$0xf0]  ;;  %v1773_v5 = vld [vmem:[#allocation5 + $0xc0] sm:$0xf] }
  0x1e   :  { %279 = vmatpush.bf16.msrb.mxu2 %v1622_v29  ;;  %328 = vmatpush.bf16.msrb.mxu3 %v1626_v30  ;;  %v1782_v2 = vor.u32 %v2030_v1, %v1781_v63  ;;  %v2028_v6 = vld [vmem:[#allocation5 + $0xc4] sm:$0xf0]  ;;  %v1710_v7 = vor.u32 %v2012_v4, %v1709_v3  ;;  %v1701_v9 = vld [vmem:[#allocation5 + $0x30] sm:$0xf]  ;;  %v2010_v10 = vld [vmem:[#allocation5 + $0x34] sm:$0xf0] }
  0x1f   :  { %v1774_v8 = vor.u32 %v2028_v6, %v1773_v5  ;;  %v1765_v11 = vld [vmem:[#allocation5 + $0xb0] sm:$0xf]  ;;  %v1702_v12 = vor.u32 %v2010_v10, %v1701_v9  ;;  %v2026_v13 = vld [vmem:[#allocation5 + $0xb4] sm:$0xf0]  ;;  %v1693_v15 = vld [vmem:[#allocation5 + $0x20] sm:$0xf] }
  0x20   :  { %857 = vmatpush.bf16.msrb.mxu0 %v1726_v58  ;;  %v1766_v14 = vor.u32 %v2026_v13, %v1765_v11  ;;  %v2008_v16 = vld [vmem:[#allocation5 + $0x24] sm:$0xf0]  ;;  %v1685_v22 = vld [vmem:[#allocation5 + $0x10] sm:$0xf]  ;;  %v2006_v23 = vld [vmem:[#allocation5 + $0x14] sm:$0xf0] }
  0x21   :  { %906 = vmatpush.bf16.msrb.mxu1 %v1790_v60  ;;  %v1694_v19 = vor.u32 %v2008_v16, %v1693_v15  ;;  %v2024_v20 = vld [vmem:[#allocation5 + $0xa4] sm:$0xf0]  ;;  %v1749_v24 = vld [vmem:[#allocation5 + $0x90] sm:$0xf]  ;;  %v1686_v25 = vor.u32 %v2006_v23, %v1685_v22  ;;  %v2022_v26 = vld [vmem:[#allocation5 + $0x94] sm:$0xf0] }
  0x22   :  { %v1750_v27 = vor.u32 %v2022_v26, %v1749_v24  ;;  %v1677_v28 = vld [vmem:[#allocation5] sm:$0xf]  ;;  %v2004_v29 = vld [vmem:[#allocation5 + $0x4] sm:$0xf0]  ;;  %v1861_v40 = vld [vmem:[#allocation5 + $0x170] sm:$0xf] }
  0x23   :  { %v1741_v30 = vld [vmem:[#allocation5 + $0x80] sm:$0xf]  ;;  %v1678_v31 = vor.u32 %v2004_v29, %v1677_v28  ;;  %v2020_v32 = vld [vmem:[#allocation5 + $0x84] sm:$0xf0]  ;;  %v2066_v46 = vld [vmem:[#allocation5 + $0x1f4] sm:$0xf0] }
  0x24   :  { %858 = vmatpush.bf16.msrb.mxu0 %v1718_v0  ;;  %v1742_v33 = vor.u32 %v2020_v32, %v1741_v30  ;;  %v2311_v34 = vld [vmem:[%s2889_s2] sm:$0xf]  ;;  %v2048_v53 = vld [vmem:[#allocation5 + $0x164] sm:$0xf0]  ;;  %v1845_v0 = vld [vmem:[#allocation5 + $0x150] sm:$0xf] }
  0x25   :  { %907 = vmatpush.bf16.msrb.mxu1 %v1782_v2  ;;  %v2314_v37 = vperm.slane %v2311_v34, 0  ;;  %v2319_v39 = vperm.slane %v2311_v34, 1  ;;  %v1853_v52 = vld [vmem:[#allocation5 + $0x160] sm:$0xf]  ;;  %v2064_v58 = vld [vmem:[#allocation5 + $0x1e4] sm:$0xf0] }
  0x26   :  { %v1854_v57 = vor.u32 %v2048_v53, %v1853_v52  ;;  %v2046_v1 = vld [vmem:[#allocation5 + $0x154] sm:$0xf0]  ;;  %v1909_v4 = vld [vmem:[#allocation5 + $0x1d0] sm:$0xf]  ;;  %v1837_v11 = vld [vmem:[#allocation5 + $0x140] sm:$0xf] }
  0x27   :  { %v1846_v3 = vor.u32 %v2046_v1, %v1845_v0  ;;  %v2062_v5 = vld [vmem:[#allocation5 + $0x1d4] sm:$0xf0]  ;;  %v1901_v13 = vld [vmem:[#allocation5 + $0x1c0] sm:$0xf]  ;;  %v2060_v16 = vld [vmem:[#allocation5 + $0x1c4] sm:$0xf0] }
  0x28   :  { %1644 = vmatmul.msk.bf16.gmra.mxu0 %vm149_vm0, %v84_v35  ;;  %1649 = vmatmul.msk.bf16.gmra.mxu3 %vm149_vm0, %v2248_v36  ;;  %v1893_v23 = vld [vmem:[#allocation5 + $0x1b0] sm:$0xf]  ;;  %v2058_v24 = vld [vmem:[#allocation5 + $0x1b4] sm:$0xf0]  ;;  %v1821_v30 = vld [vmem:[#allocation5 + $0x120] sm:$0xf] }
  0x29   :  { %1652 = vmatmul.msk.bf16.gmra.mxu1 %vm149_vm0, %v84_v35  ;;  %1657 = vmatmul.msk.bf16.gmra.mxu2 %vm149_vm0, %v2248_v36  ;;  %v1877_v53 = vld [vmem:[#allocation5 + $0x190] sm:$0xf]  ;;  %v2052_v0 = vld [vmem:[#allocation5 + $0x184] sm:$0xf0] }
  0x2a   :  { %859 = vmatpush.bf16.msrb.mxu0 %v1710_v7  ;;  %908 = vmatpush.bf16.msrb.mxu1 %v1774_v8  ;;  %v1910_v8 = vor.u32 %v2062_v5, %v1909_v4 }
  0x2e   :  { %860 = vmatpush.bf16.msrb.mxu0 %v1702_v12  ;;  %909 = vmatpush.bf16.msrb.mxu1 %v1766_v14  ;;  %v2044_v12 = vld [vmem:[#allocation5 + $0x144] sm:$0xf0] }
  0x2f   :  { %v1838_v15 = vor.u32 %v2044_v12, %v1837_v11 }
  0x32   :  { %861 = vmatpush.bf16.msrb.mxu0 %v1694_v19  ;;  %v1829_v19 = vld [vmem:[#allocation5 + $0x130] sm:$0xf] }
  0x36   :  { %862 = vmatpush.bf16.msrb.mxu0 %v1686_v25 }
  0x38   :  { %1645 = vmatmul.msk.bf16.gmra.mxu0 %vm149_vm0, %v85_v41  ;;  %1650 = vmatmul.msk.bf16.gmra.mxu3 %vm149_vm0, %v2268_v42 }
  0x39   :  { %1653 = vmatmul.msk.bf16.gmra.mxu1 %vm149_vm0, %v85_v41  ;;  %1658 = vmatmul.msk.bf16.gmra.mxu2 %vm149_vm0, %v2268_v42 }
  0x3a   :  { %863 = vmatpush.bf16.msrb.mxu0 %v1678_v31 }
  0x48   :  { %1646 = vmatmul.msk.bf16.gmra.mxu0 %vm149_vm0, %v86_v45  ;;  %1667 = vmatmul.msk.bf16.vlgmr.msrb.gmra.mxu3 %vm149_vm0, %v83_v17 }
  0x49   :  { %1654 = vmatmul.msk.bf16.gmra.mxu1 %vm149_vm0, %v86_v45  ;;  %1659 = vmatmul.msk.bf16.vlgmr.msrb.gmra.mxu2 %vm149_vm0, %v83_v17  ;;  %v1757_v17 = vld [vmem:[#allocation5 + $0xa0] sm:$0xf] }
  0x4a   :  { %v1758_v21 = vor.u32 %v2024_v20, %v1757_v17  ;;  %v1902_v17 = vor.u32 %v2060_v16, %v1901_v13  ;;  %v2042_v20 = vld [vmem:[#allocation5 + $0x134] sm:$0xf0] }
  0x4b   :  { %v1830_v22 = vor.u32 %v2042_v20, %v1829_v19 }
  0x4c   :  { %910 = vmatpush.bf16.msrb.mxu1 %v1758_v21 }
  0x50   :  { %911 = vmatpush.bf16.msrb.mxu1 %v1750_v27  ;;  %v1894_v27 = vor.u32 %v2058_v24, %v1893_v23 }
  0x54   :  { %912 = vmatpush.bf16.msrb.mxu1 %v1742_v33 }
  0x58   :  { %1647 = vmatmul.msk.bf16.gmra.mxu0 %vm149_vm0, %v2292_v48  ;;  %1668 = vmatmul.msk.bf16.gmra.mxu3 %vm149_vm0, %v84_v35 }
  0x59   :  { %1655 = vmatmul.msk.bf16.gmra.mxu1 %vm149_vm0, %v2292_v48  ;;  %1660 = vmatmul.msk.bf16.gmra.mxu2 %vm149_vm0, %v84_v35 }
  0x68   :  { %1669 = vmatmul.msk.bf16.gmra.mxu3 %vm149_vm0, %v85_v41 }
  0x69   :  { %1661 = vmatmul.msk.bf16.gmra.mxu2 %vm149_vm0, %v85_v41  ;;  %v2050_v41 = vld [vmem:[#allocation5 + $0x174] sm:$0xf0] }
  0x6a   :  { %v1862_v44 = vor.u32 %v2050_v41, %v1861_v40  ;;  %v2056_v40 = vld [vmem:[#allocation5 + $0x1a4] sm:$0xf0] }
  0x6c   :  { %954 = vmatpush.bf16.msra.mxu2 %v1862_v44 }
  0x70   :  { %955 = vmatpush.bf16.msra.mxu2 %v1854_v57 }
  0x74   :  { %956 = vmatpush.bf16.msra.mxu2 %v1846_v3 }
  0x78   :  { %1670 = vmatmul.msk.bf16.gmra.mxu3 %vm149_vm0, %v86_v45  ;;  %957 = vmatpush.bf16.msra.mxu2 %v1838_v15 }
  0x79   :  { %1662 = vmatmul.msk.bf16.gmra.mxu2 %vm149_vm0, %v86_v45  ;;  %v1925_v45 = vld [vmem:[#allocation5 + $0x1f0] sm:$0xf] }
  0x7a   :  { %v1926_v49 = vor.u32 %v2066_v46, %v1925_v45 }
  0x7c   :  { %1003 = vmatpush.bf16.msra.mxu3 %v1926_v49  ;;  %958 = vmatpush.bf16.msra.mxu2 %v1830_v22  ;;  %v2038_v49 = vld [vmem:[#allocation5 + $0x114] sm:$0xf0] }
  0x88   :  { %1671 = vmatmul.msk.bf16.gmra.mxu3 %vm149_vm0, %v2292_v48 }
  0x89   :  { %1663 = vmatmul.msk.bf16.gmra.mxu2 %vm149_vm0, %v2292_v48 }
  0x95   :  { %v183_v35 = vpop.f32.mrf.mxu0 }
  0x96   :  { %v232_v38 = vpop.f32.mrf.mxu1  ;;  %v184_v43 = vadd.f32 %v183_v35, %v2314_v37 }
  0x97   :  { %v233_v47 = vadd.f32 %v232_v38, %v2319_v39  ;;  %v1885_v38 = vld [vmem:[#allocation5 + $0x1a0] sm:$0xf] }
  0x98   :  { %1672 = vmatmul.msk.bf16.gmra.mxu3 %vm149_vm0, %v2228_v18  ;;  %v370_v54 = vmax.f32 %v184_v43, 0.0  ;;  %v1886_v44 = vor.u32 %v2056_v40, %v1885_v38  ;;  %v2392_v38 = vperm.slane %v2311_v34, 2 }
  0x99   :  { %1664 = vmatmul.msk.bf16.gmra.mxu2 %vm149_vm0, %v2228_v18  ;;  %v1917_v18 = vld [vmem:[#allocation5 + $0x1e0] sm:$0xf]  ;;  %v371_v59 = vmax.f32 %v233_v47, 0.0  ;;  %v1813_v47 = vld [vmem:[#allocation5 + $0x110] sm:$0xf] }
  0x9a   :  { %v1918_v61 = vor.u32 %v2064_v58, %v1917_v18  ;;  %v1814_v52 = vor.u32 %v2038_v49, %v1813_v47  ;;  %v2054_v18 = vld [vmem:[#allocation5 + $0x194] sm:$0xf0] }
  0x9b   :  { %v2325_v48 = vpop.f32.mrf.mxu3 }
  0x9c   :  { %v2327_v50 = vpop.f32.mrf.mxu2  ;;  %1004 = vmatpush.bf16.msra.mxu3 %v1918_v61  ;;  %v1869_v61 = vld [vmem:[#allocation5 + $0x180] sm:$0xf] }
  0x9d   :  { %v185_v51 = vpop.f32.mrf.mxu0  ;;  %v1870_v1 = vor.u32 %v2052_v0, %v1869_v61 }
  0x9e   :  { %v186_v55 = vadd.f32 %v185_v51, %v2314_v37  ;;  %v234_v56 = vpop.f32.mrf.mxu1 }
  0x9f   :  { %v235_v60 = vadd.f32 %v234_v56, %v2319_v39  ;;  %v1878_v56 = vor.u32 %v2054_v18, %v1877_v53 }
  0xa0   :  { %v374_v62 = vmax.f32 %v186_v55, 0.0  ;;  %1005 = vmatpush.bf16.msra.mxu3 %v1910_v8 }
  0xa1   :  { %v375_v63 = vmax.f32 %v235_v60, 0.0  ;;  %v2036_v60 = vld [vmem:[#allocation5 + $0x104] sm:$0xf0] }
  0xa2   :  { %v2331_v2 = vpack.c.bf16 %v374_v62, %v370_v54 }
  0xa3   :  { %v2333_v6 = vpop.f32.mrf.mxu3  ;;  %v2335_v7 = vpack.c.bf16 %v375_v63, %v371_v59  ;;  %v1805_v59 = vld [vmem:[#allocation5 + $0x100] sm:$0xf] }
  0xa4   :  { %v2337_v9 = vpop.f32.mrf.mxu2  ;;  %864 = vmatmul.bf16.vlgmr.msrb.gmra.mxu0 %v2331_v2  ;;  %1006 = vmatpush.bf16.msra.mxu3 %v1902_v17  ;;  %v1806_v63 = vor.u32 %v2036_v60, %v1805_v59 }
  0xa5   :  { %913 = vmatmul.bf16.vlgmr.msrb.gmra.mxu1 %v2335_v7  ;;  %v188_v10 = vpop.f32.mrf.mxu0 }
  0xa6   :  { %v237_v14 = vpop.f32.mrf.mxu1  ;;  %v189_v21 = vadd.f32 %v188_v10, %v2314_v37 }
  0xa7   :  { %v238_v25 = vadd.f32 %v237_v14, %v2319_v39 }
  0xa8   :  { %1673 = vmatmul.msk.bf16.gmra.mxu3 %vm149_vm0, %v2248_v36  ;;  %v378_v31 = vmax.f32 %v189_v21, 0.0 }
  0xa9   :  { %1665 = vmatmul.msk.bf16.gmra.mxu2 %vm149_vm0, %v2248_v36  ;;  %1007 = vmatpush.bf16.msra.mxu3 %v1894_v27  ;;  %v2040_v36 = vld [vmem:[#allocation5 + $0x124] sm:$0xf0]  ;;  %v379_v41 = vmax.f32 %v238_v25, 0.0 }
  0xaa   :  { %v1822_v35 = vor.u32 %v2040_v36, %v1821_v30 }
  0xab   :  { %v2347_v26 = vpop.f32.mrf.mxu3 }
  0xac   :  { %v2349_v28 = vpop.f32.mrf.mxu2  ;;  %959 = vmatpush.bf16.msra.mxu2 %v1822_v35 }
  0xad   :  { %v190_v29 = vpop.f32.mrf.mxu0  ;;  %1008 = vmatpush.bf16.msra.mxu3 %v1886_v44 }
  0xae   :  { %v191_v32 = vadd.f32 %v190_v29, %v2314_v37  ;;  %v239_v33 = vpop.f32.mrf.mxu1 }
  0xaf   :  { %v240_v43 = vadd.f32 %v239_v33, %v2319_v39 }
  0xb0   :  { %v382_v45 = vmax.f32 %v191_v32, 0.0  ;;  %960 = vmatpush.bf16.msra.mxu2 %v1814_v52 }
  0xb1   :  { %v383_v46 = vmax.f32 %v240_v43, 0.0  ;;  %1009 = vmatpush.bf16.msra.mxu3 %v1878_v56 }
  0xb2   :  { %v2353_v51 = vpack.c.bf16 %v382_v45, %v378_v31  ;;  %v2388_v31 = vperm.slane %v2311_v34, 3 }
  0xb3   :  { %v2355_v54 = vpop.f32.mrf.mxu3  ;;  %v2357_v55 = vpack.c.bf16 %v383_v46, %v379_v41 }
  0xb4   :  { %v2359_v57 = vpop.f32.mrf.mxu2  ;;  %869 = vmatmul.bf16.gmra.mxu0 %v2353_v51  ;;  %961 = vmatpush.bf16.msra.mxu2 %v1806_v63 }
  0xb5   :  { %918 = vmatmul.bf16.gmra.mxu1 %v2357_v55  ;;  %v193_v58 = vpop.f32.mrf.mxu0  ;;  %1010 = vmatpush.bf16.msra.mxu3 %v1870_v1 }
  0xb6   :  { %v242_v62 = vpop.f32.mrf.mxu1  ;;  %v194_v3 = vadd.f32 %v193_v58, %v2314_v37 }
  0xb7   :  { %v243_v4 = vadd.f32 %v242_v62, %v2319_v39 }
  0xb8   :  { %1674 = vmatmul.msk.bf16.gmra.mxu3 %vm149_vm0, %v2268_v42  ;;  %v386_v11 = vmax.f32 %v194_v3, 0.0 }
  0xb9   :  { %1666 = vmatmul.msk.bf16.gmra.mxu2 %vm149_vm0, %v2268_v42  ;;  %v387_v14 = vmax.f32 %v243_v4, 0.0 }
  0xbb   :  { %v2369_v5 = vpop.f32.mrf.mxu3 }
  0xbc   :  { %v2371_v8 = vpop.f32.mrf.mxu2 }
  0xbd   :  { %v195_v10 = vpop.f32.mrf.mxu0 }
  0xbe   :  { %v196_v12 = vadd.f32 %v195_v10, %v2314_v37  ;;  %v244_v13 = vpop.f32.mrf.mxu1 }
  0xbf   :  { %v245_v15 = vadd.f32 %v244_v13, %v2319_v39 }
  0xc0   :  { %v390_v16 = vmax.f32 %v196_v12, 0.0 }
  0xc1   :  { %v391_v17 = vmax.f32 %v245_v15, 0.0 }
  0xc2   :  { %v2375_v42 = vpack.c.bf16 %v390_v16, %v386_v11 }
  0xc3   :  { %v2377_v19 = vpop.f32.mrf.mxu3  ;;  %v2379_v20 = vpack.c.bf16 %v391_v17, %v387_v14 }
  0xc4   :  { %v2381_v21 = vpop.f32.mrf.mxu2  ;;  %874 = vmatmul.bf16.gmra.mxu0 %v2375_v42 }
  0xc5   :  { %923 = vmatmul.bf16.gmra.mxu1 %v2379_v20  ;;  %v198_v22 = vpop.f32.mrf.mxu0 }
  0xc6   :  { %v247_v23 = vpop.f32.mrf.mxu1  ;;  %v199_v24 = vadd.f32 %v198_v22, %v2314_v37 }
  0xc7   :  { %v248_v25 = vadd.f32 %v247_v23, %v2319_v39 }
  0xc8   :  { %v394_v36 = vmax.f32 %v199_v24, 0.0 }
  0xc9   :  { %v395_v35 = vmax.f32 %v248_v25, 0.0 }
  0xcb   :  { %v330_v27 = vpop.f32.mrf.mxu3 }
  0xcc   :  { %v281_v29 = vpop.f32.mrf.mxu2  ;;  %v331_v44 = vadd.f32 %v330_v27, %v2388_v31 }
  0xcd   :  { %v200_v30 = vpop.f32.mrf.mxu0  ;;  %v282_v46 = vadd.f32 %v281_v29, %v2392_v38  ;;  %v2017_v29 = vld [vmem:[#allocation5 + $0x74] sm:$0xf] }
  0xce   :  { %v201_v32 = vadd.f32 %v200_v30, %v2314_v37  ;;  %v249_v33 = vpop.f32.mrf.mxu1  ;;  %v373_v56 = vmax.f32 %v331_v44, 0.0  ;;  %v1735_v30 = vld [vmem:[#allocation5 + $0x78] sm:$0xf0] }
  0xcf   :  { %v250_v40 = vadd.f32 %v249_v33, %v2319_v39  ;;  %v372_v60 = vmax.f32 %v282_v46, 0.0 }
  0xd0   :  { %v398_v41 = vmax.f32 %v201_v32, 0.0 }
  0xd1   :  { %v399_v43 = vmax.f32 %v250_v40, 0.0  ;;  %v1799_v40 = vld [vmem:[#allocation5 + $0xf8] sm:$0xf0] }
  0xd2   :  { %v2396_v45 = vpack.c.bf16 %v398_v41, %v394_v36  ;;  %v2033_v36 = vld [vmem:[#allocation5 + $0xf4] sm:$0xf] }
  0xd3   :  { %v332_v47 = vpop.f32.mrf.mxu3  ;;  %v2399_v49 = vpack.c.bf16 %v399_v43, %v395_v35  ;;  %v1738_v35 = vor.u32 %v2017_v29, %v1735_v30  ;;  %v1802_v43 = vor.u32 %v2033_v36, %v1799_v40  ;;  %v2027_v30 = vld [vmem:[#allocation5 + $0xc4] sm:$0xf]  ;;  %v1775_v36 = vld [vmem:[#allocation5 + $0xc8] sm:$0xf0] }
  0xd4   :  { %v283_v52 = vpop.f32.mrf.mxu2  ;;  %v333_v53 = vadd.f32 %v332_v47, %v2388_v31  ;;  %879 = vmatmul.bf16.gmra.mxu0 %v2396_v45 }
  0xd5   :  { %v284_v34 = vadd.f32 %v283_v52, %v2392_v38  ;;  %928 = vmatmul.bf16.gmra.mxu1 %v2399_v49  ;;  %v203_v18 = vpop.f32.mrf.mxu0  ;;  %1052 = vmatpush.bf16.msra.mxu0 %v1738_v35 }
  0xd6   :  { %v377_v58 = vmax.f32 %v333_v53, 0.0  ;;  %v252_v59 = vpop.f32.mrf.mxu1  ;;  %v204_v0 = vadd.f32 %v203_v18, %v2314_v37  ;;  %1101 = vmatpush.bf16.msra.mxu1 %v1802_v43  ;;  %v2015_v53 = vld [vmem:[#allocation5 + $0x64] sm:$0xf]  ;;  %v2009_v43 = vld [vmem:[#allocation5 + $0x34] sm:$0xf] }
  0xd7   :  { %v376_v61 = vmax.f32 %v284_v34, 0.0  ;;  %v253_v1 = vadd.f32 %v252_v59, %v2319_v39  ;;  %v1727_v34 = vld [vmem:[#allocation5 + $0x68] sm:$0xf0] }
  0xd8   :  { %v2405_v62 = vpack.c.bf16 %v377_v58, %v373_v56  ;;  %v402_v11 = vmax.f32 %v204_v0, 0.0  ;;  %v1730_v56 = vor.u32 %v2015_v53, %v1727_v34  ;;  %v2031_v58 = vld [vmem:[#allocation5 + $0xe4] sm:$0xf]  ;;  %v1791_v59 = vld [vmem:[#allocation5 + $0xe8] sm:$0xf0]  ;;  %v211_v0 = vadd.f32 %v2333_v6, %v2314_v37 }
  0xd9   :  { %v2407_v63 = vpack.c.bf16 %v376_v61, %v372_v60  ;;  %v403_v14 = vmax.f32 %v253_v1, 0.0  ;;  %v1794_v61 = vor.u32 %v2031_v58, %v1791_v59  ;;  %v260_v1 = vadd.f32 %v2337_v9, %v2319_v39  ;;  %v1767_v34 = vld [vmem:[#allocation5 + $0xb8] sm:$0xf0] }
  0xda   :  { %1011 = vmatmul.bf16.vlgmr.msra.gmra.mxu3 %v2405_v62  ;;  %1053 = vmatpush.bf16.msra.mxu0 %v1730_v56  ;;  %v258_v6 = vadd.f32 %v2327_v50, %v2319_v39 }
  0xdb   :  { %962 = vmatmul.bf16.vlgmr.msra.gmra.mxu2 %v2407_v63  ;;  %v335_v3 = vpop.f32.mrf.mxu3  ;;  %1102 = vmatpush.bf16.msra.mxu1 %v1794_v61  ;;  %v415_v9 = vmax.f32 %v260_v1, 0.0 }
  0xdc   :  { %v286_v4 = vpop.f32.mrf.mxu2  ;;  %v336_v22 = vadd.f32 %v335_v3, %v2388_v31 }
  0xdd   :  { %v205_v10 = vpop.f32.mrf.mxu0  ;;  %v287_v24 = vadd.f32 %v286_v4, %v2392_v38  ;;  %v2013_v4 = vld [vmem:[#allocation5 + $0x54] sm:$0xf] }
  0xde   :  { %v206_v12 = vadd.f32 %v205_v10, %v2314_v37  ;;  %v254_v13 = vpop.f32.mrf.mxu1  ;;  %v381_v44 = vmax.f32 %v336_v22, 0.0  ;;  %v1719_v10 = vld [vmem:[#allocation5 + $0x58] sm:$0xf0]  ;;  %v2011_v22 = vld [vmem:[#allocation5 + $0x44] sm:$0xf] }
  0xdf   :  { %v255_v15 = vadd.f32 %v254_v13, %v2319_v39  ;;  %v380_v47 = vmax.f32 %v287_v24, 0.0  ;;  %v1711_v24 = vld [vmem:[#allocation5 + $0x48] sm:$0xf0] }
  0xe0   :  { %v406_v16 = vmax.f32 %v206_v12, 0.0  ;;  %v209_v12 = vadd.f32 %v2325_v48, %v2314_v37  ;;  %v1714_v29 = vor.u32 %v2011_v22, %v1711_v24  ;;  %v1687_v22 = vld [vmem:[#allocation5 + $0x18] sm:$0xf0]  ;;  %v2021_v24 = vld [vmem:[#allocation5 + $0x94] sm:$0xf] }
  0xe1   :  { %v407_v17 = vmax.f32 %v255_v15, 0.0  ;;  %v1783_v15 = vld [vmem:[#allocation5 + $0xd8] sm:$0xf0] }
  0xe2   :  { %v2416_v23 = vpack.c.bf16 %v406_v16, %v402_v11  ;;  %v2029_v11 = vld [vmem:[#allocation5 + $0xd4] sm:$0xf] }
  0xe3   :  { %v337_v25 = vpop.f32.mrf.mxu3  ;;  %v2419_v27 = vpack.c.bf16 %v407_v17, %v403_v14  ;;  %v1722_v14 = vor.u32 %v2013_v4, %v1719_v10  ;;  %v1786_v16 = vor.u32 %v2029_v11, %v1783_v15  ;;  %v414_v17 = vmax.f32 %v211_v0, 0.0  ;;  %v1695_v4 = vld [vmem:[#allocation5 + $0x28] sm:$0xf0] }
  0xe4   :  { %v288_v32 = vpop.f32.mrf.mxu2  ;;  %v338_v33 = vadd.f32 %v337_v25, %v2388_v31  ;;  %884 = vmatmul.bf16.gmra.mxu0 %v2416_v23  ;;  %v410_v25 = vmax.f32 %v209_v12, 0.0  ;;  %v2023_v12 = vld [vmem:[#allocation5 + $0xa4] sm:$0xf] }
  0xe5   :  { %v289_v41 = vadd.f32 %v288_v32, %v2392_v38  ;;  %933 = vmatmul.bf16.gmra.mxu1 %v2419_v27  ;;  %1054 = vmatpush.bf16.msra.mxu0 %v1722_v14  ;;  %v411_v32 = vmax.f32 %v258_v6, 0.0  ;;  %v216_v6 = vadd.f32 %v2355_v54, %v2314_v37  ;;  %v263_v54 = vadd.f32 %v2349_v28, %v2319_v39 }
  0xe6   :  { %v385_v46 = vmax.f32 %v338_v33, 0.0  ;;  %1103 = vmatpush.bf16.msra.mxu1 %v1786_v16  ;;  %v1778_v33 = vor.u32 %v2027_v30, %v1775_v36  ;;  %v2440_v35 = vpack.c.bf16 %v414_v17, %v410_v25  ;;  %v265_v16 = vadd.f32 %v2359_v57, %v2319_v39  ;;  %v1751_v36 = vld [vmem:[#allocation5 + $0x98] sm:$0xf0] }
  0xe7   :  { %v384_v52 = vmax.f32 %v289_v41, 0.0  ;;  %v2443_v41 = vpack.c.bf16 %v415_v9, %v411_v32  ;;  %v2005_v9 = vld [vmem:[#allocation5 + $0x14] sm:$0xf]  ;;  %v214_v25 = vadd.f32 %v2347_v26, %v2314_v37  ;;  %v1754_v32 = vor.u32 %v2021_v24, %v1751_v36 }
  0xe8   :  { %v2425_v18 = vpack.c.bf16 %v385_v46, %v381_v44  ;;  %v1703_v44 = vld [vmem:[#allocation5 + $0x38] sm:$0xf0]  ;;  %v2025_v46 = vld [vmem:[#allocation5 + $0xb4] sm:$0xf]  ;;  %v1690_v30 = vor.u32 %v2005_v9, %v1687_v22  ;;  %v423_v57 = vmax.f32 %v265_v16, 0.0  ;;  %v219_v16 = vadd.f32 %v2369_v5, %v2314_v37 }
  0xe9   :  { %v2427_v60 = vpack.c.bf16 %v384_v52, %v380_v47  ;;  %1055 = vmatpush.bf16.msra.mxu0 %v1714_v29  ;;  %v1706_v53 = vor.u32 %v2009_v43, %v1703_v44  ;;  %v1770_v58 = vor.u32 %v2025_v46, %v1767_v34  ;;  %v2019_v43 = vld [vmem:[#allocation5 + $0x84] sm:$0xf]  ;;  %v419_v44 = vmax.f32 %v263_v54, 0.0 }
  0xea   :  { %1016 = vmatmul.bf16.gmra.mxu3 %v2425_v18  ;;  %1104 = vmatpush.bf16.msra.mxu1 %v1778_v33  ;;  %v422_v33 = vmax.f32 %v216_v6, 0.0  ;;  %v268_v9 = vadd.f32 %v2371_v8, %v2319_v39 }
  0xeb   :  { %967 = vmatmul.bf16.gmra.mxu2 %v2427_v60  ;;  %v340_v3 = vpop.f32.mrf.mxu3 }
  0xec   :  { %v291_v13 = vpop.f32.mrf.mxu2  ;;  %v341_v48 = vadd.f32 %v340_v3, %v2388_v31  ;;  %v2007_v3 = vld [vmem:[#allocation5 + $0x24] sm:$0xf] }
  0xed   :  { %v292_v50 = vadd.f32 %v291_v13, %v2392_v38  ;;  %1056 = vmatpush.bf16.msra.mxu0 %v1706_v53  ;;  %v1698_v11 = vor.u32 %v2007_v3, %v1695_v4  ;;  %v1759_v13 = vld [vmem:[#allocation5 + $0xa8] sm:$0xf0] }
  0xee   :  { %v389_v59 = vmax.f32 %v341_v48, 0.0  ;;  %1105 = vmatpush.bf16.msra.mxu1 %v1770_v58  ;;  %v1762_v15 = vor.u32 %v2023_v12, %v1759_v13  ;;  %v2003_v48 = vld [vmem:[#allocation5 + $0x4] sm:$0xf]  ;;  %v221_v13 = vadd.f32 %v2377_v19, %v2314_v37 }
  0xef   :  { %v388_v0 = vmax.f32 %v292_v50, 0.0  ;;  %v418_v50 = vmax.f32 %v214_v25, 0.0  ;;  %v426_v25 = vmax.f32 %v219_v16, 0.0 }
  0xf0   :  { %v430_v22 = vmax.f32 %v221_v13, 0.0  ;;  %v1847_v13 = vld [vmem:[#allocation5 + $0x158] sm:$0xf0] }
  0xf1   :  { %1057 = vmatpush.bf16.msra.mxu0 %v1698_v11 }
  0xf2   :  { %1106 = vmatpush.bf16.msra.mxu1 %v1762_v15  ;;  %v270_v15 = vadd.f32 %v2381_v21, %v2319_v39 }
  0xf3   :  { %v342_v40 = vpop.f32.mrf.mxu3 }
  0xf4   :  { %v293_v47 = vpop.f32.mrf.mxu2  ;;  %v343_v52 = vadd.f32 %v342_v40, %v2388_v31  ;;  %889 = vmatmul.bf16.gmra.mxu0 %v2440_v35  ;;  %v1679_v40 = vld [vmem:[#allocation5 + $0x8] sm:$0xf0]  ;;  %v431_v24 = vmax.f32 %v270_v15, 0.0  ;;  %v2061_v15 = vld [vmem:[#allocation5 + $0x1d4] sm:$0xf] }
  0xf5   :  { %v294_v56 = vadd.f32 %v293_v47, %v2392_v38  ;;  %938 = vmatmul.bf16.gmra.mxu1 %v2443_v41  ;;  %1058 = vmatpush.bf16.msra.mxu0 %v1690_v30  ;;  %v1682_v46 = vor.u32 %v2003_v48, %v1679_v40  ;;  %v1743_v47 = vld [vmem:[#allocation5 + $0x88] sm:$0xf0]  ;;  %v2488_v30 = vpack.c.bf16 %v430_v22, %v426_v25  ;;  %v2049_v40 = vld [vmem:[#allocation5 + $0x174] sm:$0xf] }
  0xf6   :  { %v393_v61 = vmax.f32 %v343_v52, 0.0  ;;  %1107 = vmatpush.bf16.msra.mxu1 %v1754_v32  ;;  %v2464_v52 = vpack.c.bf16 %v422_v33, %v418_v50  ;;  %v1746_v53 = vor.u32 %v2019_v43, %v1743_v47  ;;  %v1863_v43 = vld [vmem:[#allocation5 + $0x178] sm:$0xf0] }
  0xf7   :  { %v392_v1 = vmax.f32 %v294_v56, 0.0  ;;  %v2467_v56 = vpack.c.bf16 %v423_v57, %v419_v44  ;;  %v2065_v44 = vld [vmem:[#allocation5 + $0x1f4] sm:$0xf]  ;;  %v1927_v47 = vld [vmem:[#allocation5 + $0x1f8] sm:$0xf0] }
  0xf8   :  { %v2449_v10 = vpack.c.bf16 %v393_v61, %v389_v59 }
  0xf9   :  { %v2451_v14 = vpack.c.bf16 %v392_v1, %v388_v0  ;;  %1059 = vmatpush.bf16.msra.mxu0 %v1682_v46  ;;  %v1866_v46 = vor.u32 %v2049_v40, %v1863_v43 }
  0xfa   :  { %1021 = vmatmul.bf16.gmra.mxu3 %v2449_v10  ;;  %1108 = vmatpush.bf16.msra.mxu1 %v1746_v53  ;;  %v1930_v53 = vor.u32 %v2065_v44, %v1927_v47  ;;  %v1831_v47 = vld [vmem:[#allocation5 + $0x138] sm:$0xf0] }
  0xfb   :  { %972 = vmatmul.bf16.gmra.mxu2 %v2451_v14  ;;  %v345_v17 = vpop.f32.mrf.mxu3 }
  0xfc   :  { %v296_v29 = vpop.f32.mrf.mxu2  ;;  %v346_v26 = vadd.f32 %v345_v17, %v2388_v31  ;;  %1150 = vmatpush.bf16.msrb.mxu2 %v1866_v46  ;;  %1199 = vmatpush.bf16.msrb.mxu3 %v1930_v53 }
  0xfd   :  { %v297_v34 = vadd.f32 %v296_v29, %v2392_v38  ;;  %v427_v29 = vmax.f32 %v268_v9, 0.0  ;;  %v1911_v9 = vld [vmem:[#allocation5 + $0x1d8] sm:$0xf0] }
  0xfe   :  { %v397_v0 = vmax.f32 %v346_v26, 0.0  ;;  %v1914_v25 = vor.u32 %v2061_v15, %v1911_v9  ;;  %v1887_v15 = vld [vmem:[#allocation5 + $0x1a8] sm:$0xf0]  ;;  %v2037_v9 = vld [vmem:[#allocation5 + $0x114] sm:$0xf] }
  0xff   :  { %v396_v3 = vmax.f32 %v297_v34, 0.0  ;;  %v2491_v54 = vpack.c.bf16 %v431_v24, %v427_v29 }
 0x103   :  { %v347_v28 = vpop.f32.mrf.mxu3 }
 0x104   :  { %v298_v58 = vpop.f32.mrf.mxu2  ;;  %v348_v59 = vadd.f32 %v347_v28, %v2388_v31  ;;  %894 = vmatmul.bf16.gmra.mxu0 %v2464_v52  ;;  %v2047_v28 = vld [vmem:[#allocation5 + $0x164] sm:$0xf] }
 0x105   :  { %v299_v61 = vadd.f32 %v298_v58, %v2392_v38  ;;  %943 = vmatmul.bf16.gmra.mxu1 %v2467_v56  ;;  %v1855_v58 = vld [vmem:[#allocation5 + $0x168] sm:$0xf0] }
 0x106   :  { %v401_v1 = vmax.f32 %v348_v59, 0.0  ;;  %v2063_v59 = vld [vmem:[#allocation5 + $0x1e4] sm:$0xf] }
 0x107   :  { %v400_v4 = vmax.f32 %v299_v61, 0.0  ;;  %v1858_v61 = vor.u32 %v2047_v28, %v1855_v58  ;;  %v1895_v28 = vld [vmem:[#allocation5 + $0x1b8] sm:$0xf0] }
 0x108   :  { %v2473_v11 = vpack.c.bf16 %v401_v1, %v397_v0  ;;  %v1919_v0 = vld [vmem:[#allocation5 + $0x1e8] sm:$0xf0] }
 0x109   :  { %v2475_v12 = vpack.c.bf16 %v400_v4, %v396_v3  ;;  %v1922_v1 = vor.u32 %v2063_v59, %v1919_v0  ;;  %1151 = vmatpush.bf16.msrb.mxu2 %v1858_v61  ;;  %v2045_v4 = vld [vmem:[#allocation5 + $0x154] sm:$0xf]  ;;  %v2039_v0 = vld [vmem:[#allocation5 + $0x124] sm:$0xf] }
 0x10a   :  { %1026 = vmatmul.bf16.gmra.mxu3 %v2473_v11 }
 0x10b   :  { %977 = vmatmul.bf16.gmra.mxu2 %v2475_v12  ;;  %v350_v6 = vpop.f32.mrf.mxu3  ;;  %1200 = vmatpush.bf16.msrb.mxu3 %v1922_v1  ;;  %v1823_v1 = vld [vmem:[#allocation5 + $0x128] sm:$0xf0] }
 0x10c   :  { %v301_v17 = vpop.f32.mrf.mxu2  ;;  %v351_v19 = vadd.f32 %v350_v6, %v2388_v31 }
 0x10d   :  { %v302_v21 = vadd.f32 %v301_v17, %v2392_v38  ;;  %v1850_v17 = vor.u32 %v2045_v4, %v1847_v13  ;;  %v2055_v4 = vld [vmem:[#allocation5 + $0x1a4] sm:$0xf]  ;;  %v1826_v13 = vor.u32 %v2039_v0, %v1823_v1 }
 0x10e   :  { %v405_v5 = vmax.f32 %v351_v19, 0.0 }
 0x10f   :  { %v404_v33 = vmax.f32 %v302_v21, 0.0  ;;  %1152 = vmatpush.bf16.msrb.mxu2 %v1850_v17  ;;  %1201 = vmatpush.bf16.msrb.mxu3 %v1914_v25 }
 0x113   :  { %v352_v36 = vpop.f32.mrf.mxu3 }
 0x114   :  { %v303_v32 = vpop.f32.mrf.mxu2  ;;  %v353_v37 = vadd.f32 %v352_v36, %v2388_v31  ;;  %899 = vmatmul.bf16.gmra.mxu0 %v2488_v30  ;;  %v2043_v36 = vld [vmem:[#allocation5 + $0x144] sm:$0xf] }
 0x115   :  { %v304_v39 = vadd.f32 %v303_v32, %v2392_v38  ;;  %948 = vmatmul.bf16.gmra.mxu1 %v2491_v54  ;;  %v1839_v32 = vld [vmem:[#allocation5 + $0x148] sm:$0xf0] }
 0x116   :  { %v409_v8 = vmax.f32 %v353_v37, 0.0  ;;  %v2059_v37 = vld [vmem:[#allocation5 + $0x1c4] sm:$0xf] }
 0x117   :  { %v408_v57 = vmax.f32 %v304_v39, 0.0 }
 0x118   :  { %v2497_v48 = vpack.c.bf16 %v409_v8, %v405_v5  ;;  %v1842_v8 = vor.u32 %v2043_v36, %v1839_v32 }
 0x119   :  { %v2499_v50 = vpack.c.bf16 %v408_v57, %v404_v33  ;;  %v1903_v33 = vld [vmem:[#allocation5 + $0x1c8] sm:$0xf0] }
 0x11a   :  { %1031 = vmatmul.bf16.gmra.mxu3 %v2497_v48  ;;  %v1906_v43 = vor.u32 %v2059_v37, %v1903_v33  ;;  %1153 = vmatpush.bf16.msrb.mxu2 %v1842_v8  ;;  %v2035_v33 = vld [vmem:[#allocation5 + $0x104] sm:$0xf] }
 0x11b   :  { %982 = vmatmul.bf16.gmra.mxu2 %v2499_v50  ;;  %v355_v26 = vpop.f32.mrf.mxu3 }
 0x11c   :  { %v306_v34 = vpop.f32.mrf.mxu2  ;;  %v356_v6 = vadd.f32 %v355_v26, %v2388_v31  ;;  %1202 = vmatpush.bf16.msrb.mxu3 %v1906_v43  ;;  %v2057_v26 = vld [vmem:[#allocation5 + $0x1b4] sm:$0xf] }
 0x11d   :  { %v307_v22 = vadd.f32 %v306_v34, %v2392_v38  ;;  %v1898_v59 = vor.u32 %v2057_v26, %v1895_v28  ;;  %v1871_v26 = vld [vmem:[#allocation5 + $0x188] sm:$0xf0] }
 0x11e   :  { %v413_v39 = vmax.f32 %v356_v6, 0.0  ;;  %v1890_v6 = vor.u32 %v2055_v4, %v1887_v15 }
 0x11f   :  { %v412_v57 = vmax.f32 %v307_v22, 0.0  ;;  %v1815_v22 = vld [vmem:[#allocation5 + $0x118] sm:$0xf0] }
 0x120   :  { %1203 = vmatpush.bf16.msrb.mxu3 %v1898_v59 }
 0x121   :  { %v2503_v3 = vpop.f32.mrf.mxu0 }
 0x122   :  { %v2506_v16 = vpop.f32.mrf.mxu1 }
 0x123   :  { %v357_v24 = vpop.f32.mrf.mxu3 }
 0x124   :  { %v308_v29 = vpop.f32.mrf.mxu2  ;;  %v358_v19 = vadd.f32 %v357_v24, %v2388_v31  ;;  %1060 = vmatmul.bf16.vlgmr.msra.gmra.mxu0 %v2331_v2  ;;  %1204 = vmatpush.bf16.msrb.mxu3 %v1890_v6  ;;  %v2053_v24 = vld [vmem:[#allocation5 + $0x194] sm:$0xf] }
 0x125   :  { %v309_v21 = vadd.f32 %v308_v29, %v2392_v38  ;;  %1109 = vmatmul.bf16.vlgmr.msra.gmra.mxu1 %v2335_v7  ;;  %v2041_v7 = vld [vmem:[#allocation5 + $0x134] sm:$0xf] }
 0x126   :  { %v417_v5 = vmax.f32 %v358_v19, 0.0  ;;  %v1834_v34 = vor.u32 %v2041_v7, %v1831_v47  ;;  %v1818_v19 = vor.u32 %v2037_v9, %v1815_v22 }
 0x127   :  { %v416_v40 = vmax.f32 %v309_v21, 0.0  ;;  %v1879_v21 = vld [vmem:[#allocation5 + $0x198] sm:$0xf0] }
 0x128   :  { %v2513_v44 = vpack.c.bf16 %v417_v5, %v413_v39  ;;  %1154 = vmatpush.bf16.msrb.mxu2 %v1834_v34  ;;  %v1882_v37 = vor.u32 %v2053_v24, %v1879_v21 }
 0x129   :  { %v2515_v2 = vpop.f32.mrf.mxu0  ;;  %v2517_v46 = vpack.c.bf16 %v416_v40, %v412_v57  ;;  %v1807_v57 = vld [vmem:[#allocation5 + $0x108] sm:$0xf0]  ;;  %v2051_v40 = vld [vmem:[#allocation5 + $0x184] sm:$0xf] }
 0x12a   :  { %v2519_v53 = vpop.f32.mrf.mxu1  ;;  %1036 = vmatmul.bf16.gmra.mxu3 %v2513_v44  ;;  %v1810_v47 = vor.u32 %v2035_v33, %v1807_v57 }
 0x12b   :  { %987 = vmatmul.bf16.gmra.mxu2 %v2517_v46  ;;  %v360_v58 = vpop.f32.mrf.mxu3  ;;  %1205 = vmatpush.bf16.msrb.mxu3 %v1882_v37 }
 0x12c   :  { %v311_v61 = vpop.f32.mrf.mxu2  ;;  %1155 = vmatpush.bf16.msrb.mxu2 %v1826_v13  ;;  %v361_v25 = vadd.f32 %v360_v58, %v2388_v31  ;;  %v1874_v58 = vor.u32 %v2051_v40, %v1871_v26  ;;  %v2071_v26 = vld [vmem:[%s2892_s5 + $0x20] sm:$0xff] }
 0x12d   :  { %v312_v36 = vadd.f32 %v311_v61, %v2392_v38 }
 0x12e   :  { %v421_v43 = vmax.f32 %v361_v25, 0.0 }
 0x12f   :  { %v420_v34 = vmax.f32 %v312_v36, 0.0  ;;  %1206 = vmatpush.bf16.msrb.mxu3 %v1874_v58 }
 0x130   :  { %1156 = vmatpush.bf16.msrb.mxu2 %v1818_v19 }
 0x131   :  { %v2523_v17 = vpop.f32.mrf.mxu0 }
 0x132   :  { %v2526_v29 = vpop.f32.mrf.mxu1 }
 0x133   :  { %v362_v32 = vpop.f32.mrf.mxu3 }
 0x134   :  { %v313_v39 = vpop.f32.mrf.mxu2  ;;  %v363_v5 = vadd.f32 %v362_v32, %v2388_v31  ;;  %1065 = vmatmul.bf16.gmra.mxu0 %v2353_v51  ;;  %1157 = vmatpush.bf16.msrb.mxu2 %v1810_v47 }
 0x135   :  { %v314_v8 = vadd.f32 %v313_v39, %v2392_v38  ;;  %1114 = vmatmul.bf16.gmra.mxu1 %v2357_v55 }
 0x136   :  { %v425_v7 = vmax.f32 %v363_v5, 0.0 }
 0x137   :  { %v424_v28 = vmax.f32 %v314_v8, 0.0 }
 0x138   :  { %v2533_v59 = vpack.c.bf16 %v425_v7, %v421_v43 }
 0x139   :  { %v2535_v51 = vpop.f32.mrf.mxu0  ;;  %v2537_v61 = vpack.c.bf16 %v424_v28, %v420_v34 }
 0x13a   :  { %1041 = vmatmul.bf16.gmra.mxu3 %v2533_v59  ;;  %v2540_v55 = vpop.f32.mrf.mxu1 }
 0x13b   :  { %992 = vmatmul.bf16.gmra.mxu2 %v2537_v61  ;;  %v365_v0 = vpop.f32.mrf.mxu3 }
 0x13c   :  { %v316_v1 = vpop.f32.mrf.mxu2  ;;  %v366_v13 = vadd.f32 %v365_v0, %v2388_v31  ;;  %v2069_v0 = vld [vmem:[%s2892_s5 + $0x10] sm:$0xff] }
 0x13d   :  { %v317_v15 = vadd.f32 %v316_v1, %v2392_v38 }
 0x13e   :  { %v429_v19 = vmax.f32 %v366_v13, 0.0 }
 0x13f   :  { %v428_v36 = vmax.f32 %v317_v15, 0.0  ;;  %v2067_v15 = vld [vmem:[%s2892_s5] sm:$0xff] }
 0x141   :  { %v2543_v4 = vpop.f32.mrf.mxu0 }
 0x142   :  { %v2549_v24 = vpop.f32.mrf.mxu1 }
 0x143   :  { %v367_v6 = vpop.f32.mrf.mxu3 }
 0x144   :  { %v318_v9 = vpop.f32.mrf.mxu2  ;;  %v368_v22 = vadd.f32 %v367_v6, %v2388_v31  ;;  %1070 = vmatmul.bf16.gmra.mxu0 %v2375_v42 }
 0x145   :  { %v319_v25 = vadd.f32 %v318_v9, %v2392_v38  ;;  %1119 = vmatmul.bf16.gmra.mxu1 %v2379_v20 }
 0x146   :  { %v433_v21 = vmax.f32 %v368_v22, 0.0  ;;  %v2644_v22 = vld [vmem:[%s2891_s4] sm:$0x3] }
 0x147   :  { %v432_v32 = vmax.f32 %v319_v25, 0.0 }
 0x148   :  { %v2553_v37 = vpack.c.bf16 %v433_v21, %v429_v19  ;;  %v2651_v19 = vperm.slane %v2644_v22, 0 }
 0x149   :  { %v2555_v39 = vpop.f32.mrf.mxu0  ;;  %v2557_v5 = vpack.c.bf16 %v432_v32, %v428_v36 }
 0x14a   :  { %1046 = vmatmul.bf16.gmra.mxu3 %v2553_v37  ;;  %v2561_v42 = vpop.f32.mrf.mxu1  ;;  %v868_v36 = vadd.f32 %v2515_v2, %v2651_v19  ;;  %v866_v32 = vadd.f32 %v2503_v3, %v2651_v19 }
 0x14b   :  { %997 = vmatmul.bf16.gmra.mxu2 %v2557_v5 }
 0x151   :  { %v2563_v31 = vpop.f32.mrf.mxu0 }
 0x152   :  { %v2567_v20 = vpop.f32.mrf.mxu1 }
 0x154   :  { %1075 = vmatmul.bf16.gmra.mxu0 %v2396_v45  ;;  %v2074_v45 = vld [vmem:[%s2892_s5 + $0x38] sm:$0xff] }
 0x155   :  { %1124 = vmatmul.bf16.gmra.mxu1 %v2399_v49  ;;  %1428 = vmatpush.bf16.msrb.mxu0 %v2074_v45 }
 0x159   :  { %v2569_v38 = vpop.f32.mrf.mxu0 }
 0x15a   :  { %1207 = vmatmul.bf16.vlgmr.msrb.gmra.mxu3 %v2405_v62  ;;  %v2579_v40 = vpop.f32.mrf.mxu1 }
 0x15b   :  { %1158 = vmatmul.bf16.vlgmr.msrb.gmra.mxu2 %v2407_v63  ;;  %v2073_v63 = vld [vmem:[%s2892_s5 + $0x30] sm:$0xff] }
 0x15c   :  { %1429 = vmatpush.bf16.msrb.mxu0 %v2073_v63  ;;  %v915_v63 = vadd.f32 %v2506_v16, %v866_v32 }
 0x15d   :  { %v2573_v8 = vpop.f32.mrf.mxu3 }
 0x15e   :  { %v2575_v33 = vpop.f32.mrf.mxu2 }
 0x15f   :  { %v964_v2 = vadd.f32 %v2575_v33, %v915_v63 }
 0x161   :  { %v2577_v57 = vpop.f32.mrf.mxu0 }
 0x162   :  { %v2596_v7 = vpop.f32.mrf.mxu1 }
 0x164   :  { %1080 = vmatmul.bf16.gmra.mxu0 %v2416_v23  ;;  %v2072_v23 = vld [vmem:[%s2892_s5 + $0x28] sm:$0xff] }
 0x165   :  { %1129 = vmatmul.bf16.gmra.mxu1 %v2419_v27  ;;  %v1014_v49 = vpop.f32.mrf.mxu3  ;;  %1430 = vmatpush.bf16.msrb.mxu0 %v2072_v23 }
 0x166   :  { %v965_v62 = vpop.f32.mrf.mxu2 }
 0x169   :  { %v2589_v43 = vpop.f32.mrf.mxu0  ;;  %1431 = vmatpush.bf16.msrb.mxu0 %v2071_v26 }
 0x16a   :  { %1212 = vmatmul.bf16.gmra.mxu3 %v2425_v18  ;;  %v2070_v18 = vld [vmem:[%s2892_s5 + $0x18] sm:$0xff]  ;;  %v2612_v58 = vpop.f32.mrf.mxu1 }
 0x16b   :  { %1163 = vmatmul.bf16.gmra.mxu2 %v2427_v60 }
 0x16d   :  { %v2598_v27 = vpop.f32.mrf.mxu3  ;;  %1432 = vmatpush.bf16.msrb.mxu0 %v2070_v18 }
 0x16e   :  { %v2600_v47 = vpop.f32.mrf.mxu2 }
 0x171   :  { %v2605_v34 = vpop.f32.mrf.mxu0  ;;  %1433 = vmatpush.bf16.msrb.mxu0 %v2069_v0 }
 0x172   :  { %v2631_v6 = vpop.f32.mrf.mxu1 }
 0x174   :  { %1085 = vmatmul.bf16.gmra.mxu0 %v2440_v35  ;;  %v2068_v35 = vld [vmem:[%s2892_s5 + $0x8] sm:$0xff] }
 0x175   :  { %1134 = vmatmul.bf16.gmra.mxu1 %v2443_v41  ;;  %v1019_v60 = vpop.f32.mrf.mxu3  ;;  %1434 = vmatpush.bf16.msrb.mxu0 %v2068_v35 }
 0x176   :  { %v970_v28 = vpop.f32.mrf.mxu2 }
 0x179   :  { %v2617_v1 = vpop.f32.mrf.mxu0  ;;  %1435 = vmatpush.bf16.msrb.mxu0 %v2067_v15 }
 0x17a   :  { %1217 = vmatmul.bf16.gmra.mxu3 %v2449_v10  ;;  %v2647_v25 = vpop.f32.mrf.mxu1 }
 0x17b   :  { %1168 = vmatmul.bf16.gmra.mxu2 %v2451_v14 }
 0x17d   :  { %v2624_v41 = vpop.f32.mrf.mxu3 }
 0x17e   :  { %v2626_v13 = vpop.f32.mrf.mxu2 }
 0x181   :  { %v2633_v9 = vpop.f32.mrf.mxu0 }
 0x184   :  { %1090 = vmatmul.bf16.gmra.mxu0 %v2464_v52 }
 0x185   :  { %1139 = vmatmul.bf16.gmra.mxu1 %v2467_v56  ;;  %v2637_v10 = vpop.f32.mrf.mxu3 }
 0x186   :  { %v2639_v14 = vpop.f32.mrf.mxu2 }
 0x189   :  { %v2653_v52 = vpop.f32.mrf.mxu0 }
 0x18a   :  { %1222 = vmatmul.bf16.gmra.mxu3 %v2473_v11  ;;  %v917_v11 = vadd.f32 %v2519_v53, %v868_v36 }
 0x18b   :  { %1173 = vmatmul.bf16.gmra.mxu2 %v2475_v12  ;;  %v2665_v12 = vpop.f32.mrf.mxu1 }
 0x18c   :  { %v966_v23 = vadd.f32 %v965_v62, %v917_v11  ;;  %v873_v62 = vadd.f32 %v2535_v51, %v2651_v19 }
 0x18d   :  { %v2655_v56 = vpop.f32.mrf.mxu3 }
 0x18e   :  { %v2657_v21 = vpop.f32.mrf.mxu2  ;;  %v1015_v3 = vadd.f32 %v1014_v49, %v966_v23 }
 0x191   :  { %v2671_v26 = vpop.f32.mrf.mxu0 }
 0x193   :  { %v2683_v16 = vpop.f32.mrf.mxu1 }
 0x194   :  { %1095 = vmatmul.bf16.gmra.mxu0 %v2488_v30  ;;  %v1013_v30 = vadd.f32 %v2573_v8, %v964_v2 }
 0x195   :  { %1144 = vmatmul.bf16.gmra.mxu1 %v2491_v54  ;;  %v2668_v45 = vpop.f32.mrf.mxu3  ;;  %v1250_v54 = vmax.f32 %v1015_v3, 0.0 }
 0x196   :  { %v2673_v18 = vpop.f32.mrf.mxu2  ;;  %v1248_v35 = vmax.f32 %v1013_v30, 0.0 }
 0x198   :  { %v1280_v33 = vpack.c.bf16 %v1250_v54, %v1248_v35 }
 0x199   :  { %v2687_v15 = vpop.f32.mrf.mxu0 }
 0x19a   :  { %1227 = vmatmul.bf16.gmra.mxu3 %v2497_v48  ;;  %v871_v48 = vadd.f32 %v2523_v17, %v2651_v19 }
 0x19b   :  { %1178 = vmatmul.bf16.gmra.mxu2 %v2499_v50  ;;  %v922_v50 = vadd.f32 %v2540_v55, %v873_v62  ;;  %v2698_v51 = vpop.f32.mrf.mxu1 }
 0x19c   :  { %v920_v49 = vadd.f32 %v2526_v29, %v871_v48  ;;  %v2080_v48 = vld [vmem:[%s2892_s5 + $0x68] sm:$0xff] }
 0x19d   :  { %v2679_v53 = vpop.f32.mrf.mxu3  ;;  %v971_v36 = vadd.f32 %v970_v28, %v922_v50  ;;  %v2079_v50 = vld [vmem:[%s2892_s5 + $0x60] sm:$0xff] }
 0x19e   :  { %v2681_v0 = vpop.f32.mrf.mxu2  ;;  %v969_v11 = vadd.f32 %v2600_v47, %v920_v49  ;;  %v2082_v47 = vld [vmem:[%s2892_s5 + $0x78] sm:$0xff] }
 0x19f   :  { %v1020_v63 = vadd.f32 %v1019_v60, %v971_v36  ;;  %v878_v60 = vadd.f32 %v2555_v39, %v2651_v19  ;;  %1477 = vmatpush.bf16.msrb.mxu1 %v2082_v47 }
 0x1a0   :  { %v1018_v17 = vadd.f32 %v2598_v27, %v969_v11  ;;  %v2081_v27 = vld [vmem:[%s2892_s5 + $0x70] sm:$0xff] }
 0x1a1   :  { %v2700_v23 = vpop.f32.mrf.mxu0  ;;  %v1254_v2 = vmax.f32 %v1020_v63, 0.0  ;;  %v927_v30 = vadd.f32 %v2561_v42, %v878_v60 }
 0x1a2   :  { %v1252_v28 = vmax.f32 %v1018_v17, 0.0  ;;  %v2077_v17 = vld [vmem:[%s2892_s5 + $0x50] sm:$0xff] }
 0x1a3   :  { %v2719_v3 = vpop.f32.mrf.mxu1  ;;  %1478 = vmatpush.bf16.msrb.mxu1 %v2081_v27  ;;  %v976_v35 = vadd.f32 %v2639_v14, %v927_v30 }
 0x1a4   :  { %1436 = vmatmul.bf16.vlgmr.msrb.gmra.mxu0 %v1280_v33 }
 0x1a5   :  { %v2692_v8 = vpop.f32.mrf.mxu3  ;;  %v1025_v42 = vadd.f32 %v2637_v10, %v976_v35  ;;  %v883_v10 = vadd.f32 %v2569_v38, %v2651_v19  ;;  %v888_v35 = vadd.f32 %v2589_v43, %v2651_v19 }
 0x1a6   :  { %v2695_v32 = vpop.f32.mrf.mxu2 }
 0x1a7   :  { %1479 = vmatpush.bf16.msrb.mxu1 %v2080_v48  ;;  %v1258_v36 = vmax.f32 %v1025_v42, 0.0 }
 0x1a9   :  { %v2722_v54 = vpop.f32.mrf.mxu0 }
 0x1aa   :  { %1232 = vmatmul.bf16.gmra.mxu3 %v2513_v44  ;;  %v876_v44 = vadd.f32 %v2543_v4, %v2651_v19 }
 0x1ab   :  { %1183 = vmatmul.bf16.gmra.mxu2 %v2517_v46  ;;  %v1282_v46 = vpack.c.bf16 %v1254_v2, %v1252_v28  ;;  %1480 = vmatpush.bf16.msrb.mxu1 %v2079_v50  ;;  %v1110_v14 = vpop.f32.mrf.mxu1  ;;  %v932_v2 = vadd.f32 %v2579_v40, %v883_v10 }
 0x1ac   :  { %v925_v39 = vadd.f32 %v2549_v24, %v876_v44 }
 0x1ad   :  { %v2705_v55 = vpop.f32.mrf.mxu3  ;;  %v981_v38 = vadd.f32 %v2673_v18, %v932_v2 }
 0x1ae   :  { %v2707_v29 = vpop.f32.mrf.mxu2  ;;  %v974_v33 = vadd.f32 %v2626_v13, %v925_v39 }
 0x1af   :  { %v1030_v40 = vadd.f32 %v2668_v45, %v981_v38 }
 0x1b0   :  { %v1023_v24 = vadd.f32 %v2624_v41, %v974_v33 }
 0x1b1   :  { %v2743_v11 = vpop.f32.mrf.mxu0  ;;  %v1262_v39 = vmax.f32 %v1030_v40, 0.0 }
 0x1b2   :  { %v1256_v63 = vmax.f32 %v1023_v24, 0.0 }
 0x1b3   :  { %v1112_v44 = vpop.f32.mrf.mxu1 }
 0x1b4   :  { %1441 = vmatmul.bf16.gmra.mxu0 %v1282_v46  ;;  %v1284_v41 = vpack.c.bf16 %v1258_v36, %v1256_v63 }
 0x1b5   :  { %v2724_v62 = vpop.f32.mrf.mxu3 }
 0x1b6   :  { %v2728_v4 = vpop.f32.mrf.mxu2 }
 0x1b9   :  { %v2768_v27 = vpop.f32.mrf.mxu0 }
 0x1ba   :  { %1237 = vmatmul.bf16.gmra.mxu3 %v2533_v59  ;;  %v2078_v59 = vld [vmem:[%s2892_s5 + $0x58] sm:$0xff] }
 0x1bb   :  { %1188 = vmatmul.bf16.gmra.mxu2 %v2537_v61  ;;  %1481 = vmatpush.bf16.msrb.mxu1 %v2078_v59  ;;  %v881_v61 = vadd.f32 %v2563_v31, %v2651_v19  ;;  %v2076_v31 = vld [vmem:[%s2892_s5 + $0x48] sm:$0xff]  ;;  %v1115_v48 = vpop.f32.mrf.mxu1  ;;  %v2796_v59 = vperm.slane %v2644_v22, 1 }
 0x1bd   :  { %v2741_v49 = vpop.f32.mrf.mxu3  ;;  %v930_v60 = vadd.f32 %v2567_v20, %v881_v61  ;;  %v2075_v20 = vld [vmem:[%s2892_s5 + $0x40] sm:$0xff]  ;;  %v1062_v61 = vadd.f32 %v2700_v23, %v2796_v59  ;;  %v1064_v22 = vadd.f32 %v2722_v54, %v2796_v59 }
 0x1be   :  { %v2745_v13 = vpop.f32.mrf.mxu2 }
 0x1bf   :  { %1482 = vmatpush.bf16.msrb.mxu1 %v2077_v17  ;;  %v979_v46 = vadd.f32 %v2657_v21, %v930_v60  ;;  %v893_v17 = vadd.f32 %v2617_v1, %v2651_v19  ;;  %v1111_v2 = vadd.f32 %v1110_v14, %v1062_v61  ;;  %v1113_v23 = vadd.f32 %v1112_v44, %v1064_v22 }
 0x1c1   :  { %v1028_v18 = vadd.f32 %v2655_v56, %v979_v46  ;;  %v2785_v33 = vpop.f32.mrf.mxu0  ;;  %v942_v38 = vadd.f32 %v2647_v25, %v893_v17 }
 0x1c3   :  { %1483 = vmatpush.bf16.msrb.mxu1 %v2076_v31  ;;  %v1260_v45 = vmax.f32 %v1028_v18, 0.0  ;;  %v1117_v10 = vpop.f32.mrf.mxu1  ;;  %v991_v1 = vadd.f32 %v2728_v4, %v942_v38 }
 0x1c4   :  { %1446 = vmatmul.bf16.gmra.mxu0 %v1284_v41 }
 0x1c5   :  { %v2758_v47 = vpop.f32.mrf.mxu3  ;;  %v1286_v42 = vpack.c.bf16 %v1262_v39, %v1260_v45 }
 0x1c6   :  { %v2762_v28 = vpop.f32.mrf.mxu2 }
 0x1c7   :  { %1484 = vmatpush.bf16.msrb.mxu1 %v2075_v20 }
 0x1ca   :  { %1242 = vmatmul.bf16.gmra.mxu3 %v2553_v37  ;;  %v886_v37 = vadd.f32 %v2577_v57, %v2651_v19 }
 0x1cb   :  { %1193 = vmatmul.bf16.gmra.mxu2 %v2557_v5  ;;  %v937_v5 = vadd.f32 %v2612_v58, %v888_v35  ;;  %v2800_v58 = vpop.f32.mrf.mxu0  ;;  %v1120_v31 = vpop.f32.mrf.mxu1  ;;  %v1040_v35 = vadd.f32 %v2724_v62, %v991_v1  ;;  %v901_v1 = vadd.f32 %v2671_v26, %v2651_v19 }
 0x1cc   :  { %v935_v50 = vadd.f32 %v2596_v7, %v886_v37  ;;  %v1067_v37 = vadd.f32 %v2743_v11, %v2796_v59 }
 0x1cd   :  { %v2777_v30 = vpop.f32.mrf.mxu3  ;;  %v986_v24 = vadd.f32 %v2695_v32, %v937_v5  ;;  %v1270_v4 = vmax.f32 %v1040_v35, 0.0  ;;  %v950_v35 = vadd.f32 %v2698_v51, %v901_v1 }
 0x1ce   :  { %v2779_v21 = vpop.f32.mrf.mxu2  ;;  %v984_v43 = vadd.f32 %v2681_v0, %v935_v50  ;;  %v1116_v62 = vadd.f32 %v1115_v48, %v1067_v37 }
 0x1cf   :  { %v1035_v57 = vadd.f32 %v2692_v8, %v986_v24  ;;  %v891_v8 = vadd.f32 %v2605_v34, %v2651_v19  ;;  %v898_v24 = vadd.f32 %v2653_v52, %v2651_v19 }
 0x1d0   :  { %v1033_v63 = vadd.f32 %v2679_v53, %v984_v43 }
 0x1d1   :  { %v1266_v41 = vmax.f32 %v1035_v57, 0.0  ;;  %v940_v40 = vadd.f32 %v2631_v6, %v891_v8  ;;  %v1069_v57 = vadd.f32 %v2768_v27, %v2796_v59  ;;  %v947_v61 = vadd.f32 %v2683_v16, %v898_v24 }
 0x1d2   :  { %v1264_v0 = vmax.f32 %v1033_v63, 0.0 }
 0x1d3   :  { %v2813_v20 = vpop.f32.mrf.mxu0  ;;  %v989_v39 = vadd.f32 %v2707_v29, %v940_v40  ;;  %v1122_v50 = vpop.f32.mrf.mxu1  ;;  %v996_v52 = vadd.f32 %v2762_v28, %v947_v61 }
 0x1d4   :  { %1451 = vmatmul.bf16.gmra.mxu0 %v1286_v42  ;;  %v1288_v53 = vpack.c.bf16 %v1266_v41, %v1264_v0 }
 0x1d5   :  { %v2788_v56 = vpop.f32.mrf.mxu3  ;;  %v1038_v44 = vadd.f32 %v2705_v55, %v989_v39  ;;  %v896_v55 = vadd.f32 %v2633_v9, %v2651_v19  ;;  %v1045_v9 = vadd.f32 %v2758_v47, %v996_v52  ;;  %v1074_v47 = vadd.f32 %v2800_v58, %v2796_v59 }
 0x1d6   :  { %v2792_v36 = vpop.f32.mrf.mxu2  ;;  %v999_v58 = vadd.f32 %v2779_v21, %v950_v35 }
 0x1d7   :  { %v1268_v29 = vmax.f32 %v1038_v44, 0.0  ;;  %v1274_v28 = vmax.f32 %v1045_v9, 0.0  ;;  %v1123_v39 = vadd.f32 %v1122_v50, %v1074_v47 }
 0x1d9   :  { %v1290_v11 = vpack.c.bf16 %v1270_v4, %v1268_v29 }
 0x1db   :  { %v2822_v43 = vpop.f32.mrf.mxu0  ;;  %v1125_v27 = vpop.f32.mrf.mxu1 }
 0x1dc   :  { %v1079_v21 = vadd.f32 %v2822_v43, %v2796_v59 }
 0x1dd   :  { %v1208_v7 = vpop.f32.mrf.mxu3 }
 0x1de   :  { %v1159_v32 = vpop.f32.mrf.mxu2 }
 0x1df   :  { %v1160_v60 = vadd.f32 %v1159_v32, %v1111_v2  ;;  %v945_v32 = vadd.f32 %v2665_v12, %v896_v55 }
 0x1e1   :  { %v1209_v18 = vadd.f32 %v1208_v7, %v1160_v60  ;;  %v1118_v7 = vadd.f32 %v1117_v10, %v1069_v57  ;;  %v994_v2 = vadd.f32 %v2745_v13, %v945_v32  ;;  %v1072_v10 = vadd.f32 %v2785_v33, %v2796_v59 }
 0x1e2   :  { %v903_v13 = vadd.f32 %v2687_v15, %v2651_v19 }
 0x1e3   :  { %v1249_v45 = vmax.f32 %v1209_v18, 0.0  ;;  %v1081_v8 = vpop.f32.mrf.mxu0  ;;  %v1043_v16 = vadd.f32 %v2741_v49, %v994_v2  ;;  %v1121_v40 = vadd.f32 %v1120_v31, %v1072_v10 }
 0x1e4   :  { %1456 = vmatmul.bf16.gmra.mxu0 %v1288_v53  ;;  %v952_v33 = vadd.f32 %v2719_v3, %v903_v13  ;;  %v1048_v3 = vadd.f32 %v2777_v30, %v999_v58  ;;  %v1082_v52 = vadd.f32 %v1081_v8, %v2796_v59 }
 0x1e5   :  { %v1210_v46 = vpop.f32.mrf.mxu3 }
 0x1e6   :  { %v1161_v14 = vpop.f32.mrf.mxu2  ;;  %v1001_v15 = vadd.f32 %v2792_v36, %v952_v33  ;;  %v1276_v24 = vmax.f32 %v1048_v3, 0.0 }
 0x1e7   :  { %v1162_v54 = vadd.f32 %v1161_v14, %v1113_v23  ;;  %v1127_v14 = vpop.f32.mrf.mxu1 }
 0x1e8   :  { %v1050_v19 = vadd.f32 %v2788_v56, %v1001_v15  ;;  %v1128_v57 = vadd.f32 %v1127_v14, %v1079_v21 }
 0x1e9   :  { %v1211_v34 = vadd.f32 %v1210_v46, %v1162_v54  ;;  %v1272_v46 = vmax.f32 %v1043_v16, 0.0 }
 0x1eb   :  { %v1251_v25 = vmax.f32 %v1211_v34, 0.0  ;;  %v1292_v49 = vpack.c.bf16 %v1274_v28, %v1272_v46  ;;  %v1083_v54 = vpop.f32.mrf.mxu0 }
 0x1ec   :  { %v1084_v2 = vadd.f32 %v1083_v54, %v2796_v59 }
 0x1ed   :  { %v1281_v6 = vpack.c.bf16 %v1251_v25, %v1249_v45  ;;  %v1213_v42 = vpop.f32.mrf.mxu3 }
 0x1ee   :  { %v1164_v5 = vpop.f32.mrf.mxu2 }
 0x1ef   :  { %1485 = vmatmul.bf16.vlgmr.msrb.gmra.mxu1 %v1281_v6  ;;  %v1165_v63 = vadd.f32 %v1164_v5, %v1116_v62  ;;  %v1077_v6 = vadd.f32 %v2813_v20, %v2796_v59  ;;  %v1278_v5 = vmax.f32 %v1050_v19, 0.0 }
 0x1f1   :  { %v1214_v0 = vadd.f32 %v1213_v42, %v1165_v63  ;;  %v1130_v42 = vpop.f32.mrf.mxu1  ;;  %v1126_v29 = vadd.f32 %v1125_v27, %v1077_v6  ;;  %v1294_v56 = vpack.c.bf16 %v1278_v5, %v1276_v24 }
 0x1f2   :  { %v1131_v43 = vadd.f32 %v1130_v42, %v1082_v52 }
 0x1f3   :  { %v1253_v53 = vmax.f32 %v1214_v0, 0.0  ;;  %v1086_v36 = vpop.f32.mrf.mxu0 }
 0x1f4   :  { %1461 = vmatmul.bf16.gmra.mxu0 %v1290_v11  ;;  %v1087_v46 = vadd.f32 %v1086_v36, %v2796_v59 }
 0x1f5   :  { %v1215_v41 = vpop.f32.mrf.mxu3 }
 0x1f6   :  { %v1166_v17 = vpop.f32.mrf.mxu2 }
 0x1f7   :  { %v1167_v48 = vadd.f32 %v1166_v17, %v1118_v7 }
 0x1f9   :  { %v1216_v22 = vadd.f32 %v1215_v41, %v1167_v48  ;;  %v1132_v11 = vpop.f32.mrf.mxu1 }
 0x1fb   :  { %v1255_v60 = vmax.f32 %v1216_v22, 0.0  ;;  %v1088_v61 = vpop.f32.mrf.mxu0 }
 0x1fc   :  { %v1089_v14 = vadd.f32 %v1088_v61, %v2796_v59 }
 0x1fd   :  { %v1283_v12 = vpack.c.bf16 %v1255_v60, %v1253_v53  ;;  %v1218_v38 = vpop.f32.mrf.mxu3  ;;  %v1133_v53 = vadd.f32 %v1132_v11, %v1084_v2 }
 0x1fe   :  { %v1169_v23 = vpop.f32.mrf.mxu2 }
 0x1ff   :  { %1490 = vmatmul.bf16.gmra.mxu1 %v1283_v12  ;;  %v1170_v18 = vadd.f32 %v1169_v23, %v1121_v40 }
 0x201   :  { %v1219_v45 = vadd.f32 %v1218_v38, %v1170_v18  ;;  %v1135_v27 = vpop.f32.mrf.mxu1 }
 0x203   :  { %v1257_v26 = vmax.f32 %v1219_v45, 0.0  ;;  %v1091_v22 = vpop.f32.mrf.mxu0 }
 0x204   :  { %1466 = vmatmul.bf16.gmra.mxu0 %v1292_v49  ;;  %v1136_v49 = vadd.f32 %v1135_v27, %v1087_v46 }
 0x205   :  { %v1220_v34 = vpop.f32.mrf.mxu3 }
 0x206   :  { %v1171_v31 = vpop.f32.mrf.mxu2 }
 0x207   :  { %v1172_v25 = vadd.f32 %v1171_v31, %v1123_v39 }
 0x209   :  { %v1221_v44 = vadd.f32 %v1220_v34, %v1172_v25  ;;  %v1137_v28 = vpop.f32.mrf.mxu1 }
 0x20a   :  { %v1138_v33 = vadd.f32 %v1137_v28, %v1089_v14 }
 0x20b   :  { %v1259_v37 = vmax.f32 %v1221_v44, 0.0  ;;  %v1093_v8 = vpop.f32.mrf.mxu0  ;;  %v1092_v44 = vadd.f32 %v1091_v22, %v2796_v59 }
 0x20d   :  { %v1285_v4 = vpack.c.bf16 %v1259_v37, %v1257_v26  ;;  %v1223_v51 = vpop.f32.mrf.mxu3 }
 0x20e   :  { %v1174_v50 = vpop.f32.mrf.mxu2 }
 0x20f   :  { %1495 = vmatmul.bf16.gmra.mxu1 %v1285_v4  ;;  %v1175_v62 = vadd.f32 %v1174_v50, %v1126_v29  ;;  %v1094_v4 = vadd.f32 %v1093_v8, %v2796_v59 }
 0x211   :  { %v1224_v20 = vadd.f32 %v1223_v51, %v1175_v62  ;;  %v1140_v54 = vpop.f32.mrf.mxu1 }
 0x212   :  { %v1141_v42 = vadd.f32 %v1140_v54, %v1092_v44 }
 0x213   :  { %v1261_v41 = vmax.f32 %v1224_v20, 0.0  ;;  %v1096_v34 = vpop.f32.mrf.mxu0 }
 0x214   :  { %1471 = vmatmul.bf16.gmra.mxu0 %v1294_v56 }
 0x215   :  { %v1225_v30 = vpop.f32.mrf.mxu3 }
 0x216   :  { %v1176_v55 = vpop.f32.mrf.mxu2 }
 0x217   :  { %v1177_v63 = vadd.f32 %v1176_v55, %v1128_v57  ;;  %v1097_v55 = vadd.f32 %v1096_v34, %v2796_v59 }
 0x219   :  { %v1226_v7 = vadd.f32 %v1225_v30, %v1177_v63  ;;  %v1142_v3 = vpop.f32.mrf.mxu1 }
 0x21a   :  { %v1143_v5 = vadd.f32 %v1142_v3, %v1094_v4 }
 0x21b   :  { %v1263_v32 = vmax.f32 %v1226_v7, 0.0  ;;  %v1098_v6 = vpop.f32.mrf.mxu0 }
 0x21c   :  { %v1099_v7 = vadd.f32 %v1098_v6, %v2796_v59 }
 0x21d   :  { %v1287_v17 = vpack.c.bf16 %v1263_v32, %v1261_v41  ;;  %v1228_v0 = vpop.f32.mrf.mxu3 }
 0x21e   :  { %v1179_v48 = vpop.f32.mrf.mxu2 }
 0x21f   :  { %1500 = vmatmul.bf16.gmra.mxu1 %v1287_v17  ;;  %v1180_v9 = vadd.f32 %v1179_v48, %v1131_v43 }
 0x221   :  { %v1229_v10 = vadd.f32 %v1228_v0, %v1180_v9  ;;  %v1145_v56 = vpop.f32.mrf.mxu1 }
 0x222   :  { %v1146_v61 = vadd.f32 %v1145_v56, %v1097_v55 }
 0x223   :  { %v1265_v23 = vmax.f32 %v1229_v10, 0.0  ;;  %v1437_v62 = vpop.f32.mrf.mxu0 }
 0x225   :  { %v1230_v60 = vpop.f32.mrf.mxu3 }
 0x226   :  { %v1181_v16 = vpop.f32.mrf.mxu2 }
 0x227   :  { %v1182_v12 = vadd.f32 %v1181_v16, %v1133_v53  ;;  %v2863_v16 = vld [vmem:[%s2893_s6] ss:$0 sm:$0xff] }
 0x228   :  { %v1438_v10 = vadd.f32 %v2863_v16, %v1437_v62 }
 0x229   :  { %v1231_v38 = vadd.f32 %v1230_v60, %v1182_v12  ;;  %v1147_v32 = vpop.f32.mrf.mxu1 }
 0x22a   :  { %v1148_v17 = vadd.f32 %v1147_v32, %v1099_v7 }
 0x22b   :  { %v1267_v13 = vmax.f32 %v1231_v38, 0.0  ;;  %v1439_v52 = vpop.f32.mrf.mxu0 }
 0x22d   :  { %v1289_v40 = vpack.c.bf16 %v1267_v13, %v1265_v23  ;;  %v1233_v47 = vpop.f32.mrf.mxu3  ;;  %v1440_v13 = vadd.f32 %v2863_v16, %v1439_v52 }
 0x22e   :  { %v1184_v1 = vpop.f32.mrf.mxu2 }
 0x22f   :  { %1505 = vmatmul.bf16.gmra.mxu1 %v1289_v40  ;;  %v1185_v18 = vadd.f32 %v1184_v1, %v1136_v49 }
 0x231   :  { %v1234_v15 = vadd.f32 %v1233_v47, %v1185_v18 }
 0x233   :  { %v1269_v25 = vmax.f32 %v1234_v15, 0.0  ;;  %v1442_v60 = vpop.f32.mrf.mxu0 }
 0x234   :  { %v1443_v47 = vadd.f32 %v2863_v16, %v1442_v60 }
 0x235   :  { %v1235_v39 = vpop.f32.mrf.mxu3 }
 0x236   :  { %v1186_v35 = vpop.f32.mrf.mxu2 }
 0x237   :  { %v1187_v31 = vadd.f32 %v1186_v35, %v1138_v33 }
 0x239   :  { %v1236_v45 = vadd.f32 %v1235_v39, %v1187_v31 }
 0x23b   :  { %v1271_v58 = vmax.f32 %v1236_v45, 0.0  ;;  %v1444_v59 = vpop.f32.mrf.mxu0 }
 0x23c   :  { %v1445_v33 = vadd.f32 %v2863_v16, %v1444_v59 }
 0x23d   :  { %v1291_v19 = vpack.c.bf16 %v1271_v58, %v1269_v25  ;;  %v1238_v26 = vpop.f32.mrf.mxu3 }
 0x23e   :  { %v1189_v37 = vpop.f32.mrf.mxu2 }
 0x23f   :  { %1510 = vmatmul.bf16.gmra.mxu1 %v1291_v19  ;;  %v1190_v51 = vadd.f32 %v1189_v37, %v1141_v42 }
 0x241   :  { %v1239_v24 = vadd.f32 %v1238_v26, %v1190_v51 }
 0x243   :  { %v1273_v57 = vmax.f32 %v1239_v24, 0.0  ;;  %v1447_v23 = vpop.f32.mrf.mxu0 }
 0x244   :  { %v1448_v15 = vadd.f32 %v2863_v16, %v1447_v23 }
 0x245   :  { %v1240_v36 = vpop.f32.mrf.mxu3 }
 0x246   :  { %v1191_v50 = vpop.f32.mrf.mxu2 }
 0x247   :  { %v1192_v29 = vadd.f32 %v1191_v50, %v1143_v5 }
 0x249   :  { %v1241_v21 = vadd.f32 %v1240_v36, %v1192_v29 }
 0x24b   :  { %v1275_v30 = vmax.f32 %v1241_v21, 0.0  ;;  %v1449_v1 = vpop.f32.mrf.mxu0 }
 0x24c   :  { %v1450_v44 = vadd.f32 %v2863_v16, %v1449_v1 }
 0x24d   :  { %v1293_v11 = vpack.c.bf16 %v1275_v30, %v1273_v57  ;;  %v1243_v63 = vpop.f32.mrf.mxu3 }
 0x24e   :  { %v1194_v20 = vpop.f32.mrf.mxu2 }
 0x24f   :  { %1515 = vmatmul.bf16.gmra.mxu1 %v1293_v11  ;;  %v1195_v41 = vadd.f32 %v1194_v20, %v1146_v61 }
 0x251   :  { %v1244_v48 = vadd.f32 %v1243_v63, %v1195_v41 }
 0x253   :  { %v1277_v22 = vmax.f32 %v1244_v48, 0.0  ;;  %v1452_v34 = vpop.f32.mrf.mxu0 }
 0x254   :  { %v1453_v6 = vadd.f32 %v2863_v16, %v1452_v34 }
 0x255   :  { %v1245_v2 = vpop.f32.mrf.mxu3 }
 0x256   :  { %v1196_v0 = vpop.f32.mrf.mxu2 }
 0x257   :  { %v1197_v43 = vadd.f32 %v1196_v0, %v1148_v17 }
 0x259   :  { %v1246_v27 = vadd.f32 %v1245_v2, %v1197_v43 }
 0x25b   :  { %v1279_v9 = vmax.f32 %v1246_v27, 0.0  ;;  %v1454_v58 = vpop.f32.mrf.mxu0 }
 0x25c   :  { %v1455_v5 = vadd.f32 %v2863_v16, %v1454_v58 }
 0x25d   :  { %v1295_v53 = vpack.c.bf16 %v1279_v9, %v1277_v22 }
 0x25f   :  { %1520 = vmatmul.bf16.gmra.mxu1 %v1295_v53 }
 0x263   :  { %v1457_v3 = vpop.f32.mrf.mxu0 }
 0x264   :  { %v1458_v21 = vadd.f32 %v2863_v16, %v1457_v3 }
 0x26b   :  { %v1459_v36 = vpop.f32.mrf.mxu0 }
 0x26c   :  { %v1486_v12 = vpop.f32.mrf.mxu1  ;;  %v1460_v55 = vadd.f32 %v2863_v16, %v1459_v36  ;;  %v2156_v36 = vmov 0  }
 0x26d   :  { %v1487_v38 = vadd.f32 %v1486_v12, %v1438_v10  ;;  %2094 = vset.pattern.permute.xlu1 %v2156_v36 }
 0x26f   :  { %v1526_v28 = vmax.f32 %v1487_v38, 0.0 }
 0x271   :  { %1542 = vxpose.xlu0.b32.start [1/16] %v1526_v28, 128 }
 0x273   :  { %v1462_v57 = vpop.f32.mrf.mxu0 }
 0x274   :  { %v1488_v8 = vpop.f32.mrf.mxu1  ;;  %v1463_v7 = vadd.f32 %v2863_v16, %v1462_v57 }
 0x275   :  { %v1489_v46 = vadd.f32 %v1488_v8, %v1440_v13 }
 0x277   :  { %v1527_v40 = vmax.f32 %v1489_v46, 0.0 }
 0x279   :  { %1543 = vxpose.xlu0.b32.cont [2/16] %v1527_v40, 128 }
 0x27b   :  { %v1464_v61 = vpop.f32.mrf.mxu0 }
 0x27c   :  { %v1491_v49 = vpop.f32.mrf.mxu1  ;;  %v1465_v0 = vadd.f32 %v2863_v16, %v1464_v61 }
 0x27d   :  { %v1492_v14 = vadd.f32 %v1491_v49, %v1443_v47 }
 0x27f   :  { %v1528_v18 = vmax.f32 %v1492_v14, 0.0 }
 0x281   :  { %1544 = vxpose.xlu0.b32.cont [3/16] %v1528_v18, 128 }
 0x283   :  { %v1467_v17 = vpop.f32.mrf.mxu0 }
 0x284   :  { %v1493_v54 = vpop.f32.mrf.mxu1  ;;  %v1468_v27 = vadd.f32 %v2863_v16, %v1467_v17 }
 0x285   :  { %v1494_v39 = vadd.f32 %v1493_v54, %v1445_v33 }
 0x287   :  { %v1529_v35 = vmax.f32 %v1494_v39, 0.0 }
 0x289   :  { %1545 = vxpose.xlu0.b32.cont [4/16] %v1529_v35, 128 }
 0x28b   :  { %v1469_v22 = vpop.f32.mrf.mxu0 }
 0x28c   :  { %v1496_v31 = vpop.f32.mrf.mxu1  ;;  %v1470_v59 = vadd.f32 %v2863_v16, %v1469_v22 }
 0x28d   :  { %v1497_v45 = vadd.f32 %v1496_v31, %v1448_v15 }
 0x28f   :  { %v1530_v25 = vmax.f32 %v1497_v45, 0.0 }
 0x291   :  { %1546 = vxpose.xlu0.b32.cont [5/16] %v1530_v25, 128 }
 0x293   :  { %v1472_v38 = vpop.f32.mrf.mxu0 }
 0x294   :  { %v1498_v19 = vpop.f32.mrf.mxu1  ;;  %v1473_v23 = vadd.f32 %v2863_v16, %v1472_v38 }
 0x295   :  { %v1499_v26 = vadd.f32 %v1498_v19, %v1450_v44 }
 0x297   :  { %v1531_v37 = vmax.f32 %v1499_v26, 0.0 }
 0x299   :  { %1547 = vxpose.xlu0.b32.cont [6/16] %v1531_v37, 128 }
 0x29b   :  { %v1474_v40 = vpop.f32.mrf.mxu0 }
 0x29c   :  { %v1501_v42 = vpop.f32.mrf.mxu1  ;;  %v1475_v47 = vadd.f32 %v2863_v16, %v1474_v40 }
 0x29d   :  { %v1502_v4 = vadd.f32 %v1501_v42, %v1453_v6 }
 0x29f   :  { %v1532_v51 = vmax.f32 %v1502_v4, 0.0 }
 0x2a1   :  { %1548 = vxpose.xlu0.b32.cont [7/16] %v1532_v51, 128 }
 0x2a4   :  { %v1503_v50 = vpop.f32.mrf.mxu1 }
 0x2a5   :  { %v1504_v24 = vadd.f32 %v1503_v50, %v1455_v5  ;;  %v2097_v5 = vld [vmem:[#allocation2] ss:$0 sm:$0xff] }
 0x2a6   :  { %1587 = vperm.xlu1 %2094, %v2097_v5  }
 0x2a7   :  { %v1533_v29 = vmax.f32 %v1504_v24, 0.0 }
 0x2a9   :  { %1549 = vxpose.xlu0.b32.cont [8/16] %v1533_v29, 128 }
 0x2ac   :  { %v1506_v56 = vpop.f32.mrf.mxu1 }
 0x2ad   :  { %v1507_v62 = vadd.f32 %v1506_v56, %v1458_v21  ;;  %v1582_v21 = vld [vmem:[%s2894_s7] sm:$0xf] }
 0x2af   :  { %v1534_v30 = vmax.f32 %v1507_v62, 0.0 }
 0x2b1   :  { %1550 = vxpose.xlu0.b32.cont [9/16] %v1534_v30, 128 }
 0x2b4   :  { %v1508_v11 = vpop.f32.mrf.mxu1 }
 0x2b5   :  { %v1509_v20 = vadd.f32 %v1508_v11, %v1460_v55 }
 0x2b7   :  { %v1535_v63 = vmax.f32 %v1509_v20, 0.0 }
 0x2b9   :  { %1551 = vxpose.xlu0.b32.cont [10/16] %v1535_v63, 128 }
 0x2bc   :  { %v1511_v41 = vpop.f32.mrf.mxu1 }
 0x2bd   :  { %v1512_v32 = vadd.f32 %v1511_v41, %v1463_v7 }
 0x2bf   :  { %v1536_v52 = vmax.f32 %v1512_v32, 0.0 }
 0x2c1   :  { %1552 = vxpose.xlu0.b32.cont [11/16] %v1536_v52, 128 }
 0x2c4   :  { %v1513_v48 = vpop.f32.mrf.mxu1 }
 0x2c5   :  { %v1514_v43 = vadd.f32 %v1513_v48, %v1465_v0 }
 0x2c7   :  { %v1537_v2 = vmax.f32 %v1514_v43, 0.0 }
 0x2c9   :  { %1553 = vxpose.xlu0.b32.cont [12/16] %v1537_v2, 128 }
 0x2cc   :  { %v1516_v9 = vpop.f32.mrf.mxu1 }
 0x2cd   :  { %v1517_v53 = vadd.f32 %v1516_v9, %v1468_v27 }
 0x2cf   :  { %v1538_v60 = vmax.f32 %v1517_v53, 0.0 }
 0x2d1   :  { %1554 = vxpose.xlu0.b32.cont [13/16] %v1538_v60, 128 }
 0x2d4   :  { %v1518_v10 = vpop.f32.mrf.mxu1 }
 0x2d5   :  { %v1519_v12 = vadd.f32 %v1518_v10, %v1470_v59 }
 0x2d7   :  { %v1539_v28 = vmax.f32 %v1519_v12, 0.0 }
 0x2d9   :  { %1555 = vxpose.xlu0.b32.cont [14/16] %v1539_v28, 128 }
 0x2dc   :  { %v1521_v13 = vpop.f32.mrf.mxu1 }
 0x2dd   :  { %v1522_v8 = vadd.f32 %v1521_v13, %v1473_v23 }
 0x2df   :  { %v1540_v46 = vmax.f32 %v1522_v8, 0.0 }
 0x2e1   :  { %1556 = vxpose.xlu0.b32.cont [15/16] %v1540_v46, 128 }
 0x2e4   :  { %v1523_v1 = vpop.f32.mrf.mxu1 }
 0x2e5   :  { %v1524_v49 = vadd.f32 %v1523_v1, %v1475_v47 }
 0x2e7   :  { %v1541_v14 = vmax.f32 %v1524_v49, 0.0 }
 0x2e9   :  { %1557 = vxpose.xlu0.b32.end [16/16] %v1541_v14, 128 }
 0x315   :  { %v1558_v18 = vpop.trf.xlu0 }
 0x318   :  { %v1588_v56 = vpop.permute.xlu1 %1587 }
 0x31d   :  { %v1559_v33 = vpop.trf.xlu0 }
 0x31e   :  { %v1574_v54 = vpack.c.bf16 %v1559_v33, %v1558_v18 }
 0x325   :  { %v1560_v39 = vpop.trf.xlu0 }
 0x32d   :  { %v1561_v34 = vpop.trf.xlu0 }
 0x32e   :  { %v1575_v35 = vpack.c.bf16 %v1561_v34, %v1560_v39 }
 0x335   :  { %v1562_v15 = vpop.trf.xlu0 }
 0x33d   :  { %v1563_v31 = vpop.trf.xlu0 }
 0x33e   :  { %v1576_v45 = vpack.c.bf16 %v1563_v31, %v1562_v15 }
 0x345   :  { %v1564_v25 = vpop.trf.xlu0 }
 0x34d   :  { %v1565_v58 = vpop.trf.xlu0 }
 0x34e   :  { %v1577_v44 = vpack.c.bf16 %v1565_v58, %v1564_v25 }
 0x350   :  { %2095 = vset.pattern.permute.xlu0 %v2156_v36 }
 0x355   :  { %v1566_v19 = vpop.trf.xlu0 }
 0x35d   :  { %v1567_v26 = vpop.trf.xlu0 }
 0x35e   :  { %v1578_v29 = vpack.c.bf16 %v1567_v26, %v1566_v19 }
 0x365   :  { %v1568_v37 = vpop.trf.xlu0 }
 0x36d   :  { %v1569_v16 = vpop.trf.xlu0 }
 0x36e   :  { %v1579_v24 = vpack.c.bf16 %v1569_v16, %v1568_v37 }
 0x375   :  { %v1570_v3 = vpop.trf.xlu0 }
 0x37d   :  { %v1571_v6 = vpop.trf.xlu0 }
 0x37e   :  { %v1580_v50 = vpack.c.bf16 %v1571_v6, %v1570_v3 }
 0x385   :  { %v1572_v42 = vpop.trf.xlu0 }
 0x38d   :  { %v1573_v4 = vpop.trf.xlu0 }
 0x38e   :  { %v1581_v51 = vpack.c.bf16 %v1573_v4, %v1572_v42 }
 0x390   :  { %1590 = vmatpush.bf16.msra.mxu2 %v1581_v51 }
 0x394   :  { %1591 = vmatpush.bf16.msra.mxu2 %v1580_v50 }
 0x398   :  { %1592 = vmatpush.bf16.msra.mxu2 %v1579_v24 }
 0x39c   :  { %1593 = vmatpush.bf16.msra.mxu2 %v1578_v29 }
 0x3a0   :  { %1594 = vmatpush.bf16.msra.mxu2 %v1577_v44 }
 0x3a4   :  { %1595 = vmatpush.bf16.msra.mxu2 %v1576_v45 }
 0x3a8   :  { %1596 = vmatpush.bf16.msra.mxu2 %v1575_v35 }
 0x3ac   :  { %1597 = vmatpush.bf16.msra.mxu2 %v1574_v54 }
 0x3af   :  { %1598 = vmatmul.bf16.vlgmr.msra.gmra.mxu2 %v1582_v21 }
 0x432   :  { %v1599_v62 = vpop.f32.mrf.mxu2 }
 0x433   :  { %v1600_v57 = vadd.f32 %v1599_v62, %v1588_v56 }
 0x435   :  { %v1603_v30 = vmax.f32 %v1600_v57, 0.0 }
 0x437   :  { %1604 = vst [vmem:[%s2896_s9] sm:$0x1] %v1603_v30 }
 0x43a   :  { %v1601_v55 = vpop.f32.mrf.mxu2 }
 0x43b   :  { %1609 = vsyncpa [#allocation4], 1 }
 0x43c   :  { %1610 = vsyncpa [#allocation6], 1 }

</bundles_post_ra>
